<compile_context>
chip_gen: v6e
topology: v6e:2x2x1
jax: 0.10.0
libtpu: 0.0.40
codegen_flags: <defaults>
</compile_context>

<pallas_src>
import functools

import numpy as np
import jax
import jax.numpy as jnp
from jax.experimental import pallas as pl
from jax.experimental.pallas import tpu as pltpu

BN_EPS = 1e-5


# ----------------------------------------------------------------------------
# Fused Pallas kernel: the whole forward pass in a single pallas_call.
# ----------------------------------------------------------------------------
def _fused_forward_kernel(x_ref, code_ref, t1_ref, t2_ref, t3_ref,
                          w1_ref, b1_ref, w2_ref, b2_ref,
                          sw_ref, sb_ref, gat_ref, spr_ref,
                          o_ref, pad1_ref, pad2_ref,
                          *, N, H, W, CIN, C):
    f32 = jnp.float32
    ROWS = N * H
    LANES = W * C                                   # 128 at the chosen sizes
    count = float(N * H * W)

    # ---- writer-code adaptation MLPs for all three CBN layers, consolidated
    #      into two matmuls (stacked W1, block-diagonal W2) -------------------
    code = code_ref[...].astype(f32)                                    # (N, Wc)
    hmlp = jnp.maximum(
        jnp.dot(code, w1_ref[...], preferred_element_type=f32) + b1_ref[...],
        0.0)                                                            # (N, 3*Hid)
    wb = jnp.dot(hmlp, w2_ref[...], preferred_element_type=f32) + b2_ref[...]  # (N, 3*2C)

    S = gat_ref[...]       # (W*C, C) one-hot: per-channel gather (sum over w)
    ST = spr_ref[...]      # (C, W*C) one-hot: per-channel spread over w
    sw = sw_ref[...]       # (3, C) stored ("pretrained") BN weights
    sb = sb_ref[...]       # (3, C) stored BN biases

    def conv(pad_ref, t_ref, k):
        # 3 lane-dense matmuls (one per kernel row); width padding is folded
        # into the banded weight, height halo rows of pad_ref stay zero.
        acc = jnp.zeros((ROWS, LANES), f32)
        for kh in range(3):
            rows = pad_ref[:, kh:kh + H, :].reshape(ROWS, k)
            acc = acc + jnp.dot(rows, t_ref[kh], preferred_element_type=f32)
        return acc                                                      # (N*H, W*C)

    def cond_bn(y, layer, relu):
        # y: (N*H, W*C); channel c of width position w lives at lane w*C + c.
        # Batch statistics over (N, H, W) per channel, two-pass variance.
        sum_wc = jnp.sum(y, axis=0, keepdims=True)                      # (1, W*C)
        mean_c = jnp.dot(sum_wc, S, preferred_element_type=f32) / count  # (1, C)
        mean_wc = jnp.dot(mean_c, ST, preferred_element_type=f32)       # (1, W*C)
        cen = y - mean_wc
        var_c = jnp.dot(jnp.sum(cen * cen, axis=0, keepdims=True), S,
                        preferred_element_type=f32) / count             # (1, C)
        inv_std = jax.lax.rsqrt(var_c + BN_EPS)                         # (1, C)

        dwb = wb[:, 2 * C * layer:2 * C * (layer + 1)]                  # (N, 2C)
        weight = sw[layer:layer + 1, :] + dwb[:, :C]                    # (N, C)
        bias = sb[layer:layer + 1, :] + dwb[:, C:]                      # (N, C)
        scale_c = weight * inv_std                                      # (N, C)
        shift_c = bias - scale_c * mean_c                               # (N, C)
        scale = jnp.dot(scale_c, ST, preferred_element_type=f32)        # (N, W*C)
        shift = jnp.dot(shift_c, ST, preferred_element_type=f32)        # (N, W*C)

        out = y.reshape(N, H, LANES) * scale[:, None, :] + shift[:, None, :]
        if relu:
            out = jnp.maximum(out, 0.0)
        return out.reshape(ROWS, LANES)

    # ---- zero-init the padded scratch (halo rows remain zero thereafter) ----
    pad1_ref[...] = jnp.zeros((N, H + 2, W * CIN), f32)
    pad2_ref[...] = jnp.zeros((N, H + 2, LANES), f32)

    # ---- stem: conv1 -> CBN1 -> ReLU ----------------------------------------
    pad1_ref[:, 1:H + 1, :] = x_ref[...].astype(f32)
    y = cond_bn(conv(pad1_ref, t1_ref, W * CIN), 0, relu=True)

    # ---- residual block: conv2 -> CBN2 -> ReLU -> conv3 -> CBN3 -> +skip ----
    skip = y
    pad2_ref[:, 1:H + 1, :] = y.reshape(N, H, LANES)
    y = cond_bn(conv(pad2_ref, t2_ref, LANES), 1, relu=True)
    pad2_ref[:, 1:H + 1, :] = y.reshape(N, H, LANES)
    y = cond_bn(conv(pad2_ref, t3_ref, LANES), 2, relu=False)
    y = jnp.maximum(y + skip, 0.0)

    o_ref[...] = y.reshape(N, H, LANES).astype(o_ref.dtype)


def _full_spec(shape):
    return pl.BlockSpec(shape, lambda i: (0,) * len(shape))


def writer_adaptive_resnet_forward(imgs_nchw, writer_code, params):
    """imgs_nchw: (N, Cin, H, W) f32; writer_code: (N, writer_code_size) f32."""
    N, CIN, H, W = imgs_nchw.shape
    C = params["sw_all"].shape[1]
    # NCHW -> lane-dense channels-minor rows (N, H, W*Cin).
    x = jnp.transpose(imgs_nchw, (0, 2, 3, 1)).reshape(N, H, W * CIN)

    args = (x, writer_code,
            params["t1"], params["t2"], params["t3"],
            params["w1_all"], params["b1_all"],
            params["w2_bd"], params["b2_all"],
            params["sw_all"], params["sb_all"],
            params["gather"], params["spread"])

    out = pl.pallas_call(
        functools.partial(_fused_forward_kernel, N=N, H=H, W=W, CIN=CIN, C=C),
        out_shape=jax.ShapeDtypeStruct((N, H, W * C), jnp.float32),
        grid=(1,),
        in_specs=[_full_spec(a.shape) for a in args],
        out_specs=_full_spec((N, H, W * C)),
        scratch_shapes=[
            pltpu.VMEM((N, H + 2, W * CIN), jnp.float32),
            pltpu.VMEM((N, H + 2, W * C), jnp.float32),
        ],
        compiler_params=pltpu.CompilerParams(
            dimension_semantics=("arbitrary",)),
    )(*args)

    # (N, H, W*C) lane-dense kernel output -> NCHW.
    return jnp.transpose(out.reshape(N, H, W, C), (0, 3, 1, 2))


# ----------------------------------------------------------------------------
# Parameter construction (deterministic, synthetic) + host-side packing
# ----------------------------------------------------------------------------
def make_cbn_params(key, writer_code_size, hidden, C):
    k1, k2, k3, k4, k5, k6 = jax.random.split(key, 6)
    w1 = 0.1 * jax.random.normal(k1, (writer_code_size, hidden), jnp.float32)
    b1 = 0.1 * jax.random.normal(k2, (1, hidden), jnp.float32)
    w2 = 0.1 * jax.random.normal(k3, (hidden, 2 * C), jnp.float32)
    b2 = 0.1 * jax.random.normal(k4, (1, 2 * C), jnp.float32)
    # Stored ("pretrained") BN affine params (cloned before being reset to 1/0).
    sw = 1.0 + 0.1 * jax.random.normal(k5, (1, C), jnp.float32)
    sb = 0.1 * jax.random.normal(k6, (1, C), jnp.float32)
    return (w1, b1, w2, b2, sw, sb)


def _toeplitz_conv_weight(wt, W):
    """(3,3,Cin,Cout) -> (3, W*Cin, W*Cout) banded matrices (one per kernel row).

    T[kh, wi*Cin+ci, wo*Cout+co] = wt[kh, wi-wo+1, ci, co] for |wi-wo| <= 1,
    so a full lane-dense image row maps to a full output row and the 'SAME'
    width padding is absorbed into the band structure.
    """
    wt = np.asarray(wt, np.float32)
    _, _, cin, cout = wt.shape
    t = np.zeros((3, W * cin, W * cout), np.float32)
    for kh in range(3):
        for wo in range(W):
            for kw in range(3):
                wi = wo + kw - 1
                if 0 <= wi < W:
                    t[kh, wi * cin:(wi + 1) * cin,
                      wo * cout:(wo + 1) * cout] = wt[kh, kw]
    return jnp.asarray(t)


def _pack_adaptation(cbn_list):
    """Stack the 3 per-layer writer-code MLPs into one stacked/block-diag MLP."""
    w1s = [np.asarray(p[0]) for p in cbn_list]
    b1s = [np.asarray(p[1]) for p in cbn_list]
    w2s = [np.asarray(p[2]) for p in cbn_list]
    b2s = [np.asarray(p[3]) for p in cbn_list]
    hid, out = w2s[0].shape
    w1_all = np.concatenate(w1s, axis=1)                     # (Wc, 3*Hid)
    b1_all = np.concatenate(b1s, axis=1)                     # (1, 3*Hid)
    w2_bd = np.zeros((3 * hid, 3 * out), np.float32)
    for l in range(3):
        w2_bd[l * hid:(l + 1) * hid, l * out:(l + 1) * out] = w2s[l]
    b2_all = np.concatenate(b2s, axis=1)                     # (1, 3*2C)
    sw_all = np.concatenate([np.asarray(p[4]) for p in cbn_list], axis=0)  # (3, C)
    sb_all = np.concatenate([np.asarray(p[5]) for p in cbn_list], axis=0)  # (3, C)
    return (jnp.asarray(w1_all), jnp.asarray(b1_all), jnp.asarray(w2_bd),
            jnp.asarray(b2_all), jnp.asarray(sw_all), jnp.asarray(sb_all))


def _channel_gather_spread(W, C):
    s = np.zeros((W * C, C), np.float32)
    for w in range(W):
        s[w * C:(w + 1) * C, :] = np.eye(C, dtype=np.float32)
    return jnp.asarray(s), jnp.asarray(np.ascontiguousarray(s.T))


def make_params(key, cin, c1, img_w, writer_code_size, hidden):
    keys = jax.random.split(key, 6)
    conv1_w = (1.0 / (9 * cin) ** 0.5) * jax.random.normal(
        keys[0], (3, 3, cin, c1), jnp.float32)
    conv2_w = (1.0 / (9 * c1) ** 0.5) * jax.random.normal(
        keys[1], (3, 3, c1, c1), jnp.float32)
    conv3_w = (1.0 / (9 * c1) ** 0.5) * jax.random.normal(
        keys[2], (3, 3, c1, c1), jnp.float32)
    cbn1 = make_cbn_params(keys[3], writer_code_size, hidden, c1)
    cbn2 = make_cbn_params(keys[4], writer_code_size, hidden, c1)
    cbn3 = make_cbn_params(keys[5], writer_code_size, hidden, c1)

    w1_all, b1_all, w2_bd, b2_all, sw_all, sb_all = _pack_adaptation(
        [cbn1, cbn2, cbn3])
    gather, spread = _channel_gather_spread(img_w, c1)

    return {
        # packed, kernel-side parameters
        "t1": _toeplitz_conv_weight(conv1_w, img_w),
        "t2": _toeplitz_conv_weight(conv2_w, img_w),
        "t3": _toeplitz_conv_weight(conv3_w, img_w),
        "w1_all": w1_all, "b1_all": b1_all, "w2_bd": w2_bd, "b2_all": b2_all,
        "sw_all": sw_all, "sb_all": sb_all,
        "gather": gather, "spread": spread,
        # raw parameters (used only by the pure-JAX reference check)
        "conv1_w": conv1_w, "conv2_w": conv2_w, "conv3_w": conv3_w,
        "cbn1": cbn1, "cbn2": cbn2, "cbn3": cbn3,
    }


# ----------------------------------------------------------------------------
# Pure-JAX reference (correctness check only)
# ----------------------------------------------------------------------------
def reference_forward(imgs_nchw, writer_code, params):
    x = jnp.transpose(imgs_nchw, (0, 2, 3, 1))

    def conv(x, w):
        return jax.lax.conv_general_dilated(
            x, w, window_strides=(1, 1), padding="SAME",
            dimension_numbers=("NHWC", "HWIO", "NHWC"))

    def cbn(x, p, relu):
        w1, b1, w2, b2, sw, sb = p
        c = x.shape[-1]
        mean = jnp.mean(x, axis=(0, 1, 2))
        var = jnp.mean((x - mean) ** 2, axis=(0, 1, 2))
        xn = (x - mean) * jax.lax.rsqrt(var + BN_EPS)
        h = jnp.maximum(writer_code @ w1 + b1, 0.0)
        wb = h @ w2 + b2
        weight = sw + wb[:, :c]
        bias = sb + wb[:, c:]
        y = xn * weight[:, None, None, :] + bias[:, None, None, :]
        return jnp.maximum(y, 0.0) if relu else y

    x = cbn(conv(x, params["conv1_w"]), params["cbn1"], True)
    skip = x
    y = cbn(conv(x, params["conv2_w"]), params["cbn2"], True)
    y = cbn(conv(y, params["conv3_w"]), params["cbn3"], False)
    x = jnp.maximum(y + skip, 0.0)
    return jnp.transpose(x, (0, 3, 1, 2))


if __name__ == "__main__":
    N, CIN, H, W = 2, 4, 16, 16
    C1 = 8                        # W * C1 = 128 -> exact 128-lane rows
    WRITER_CODE_SIZE = 32
    ADAPT_HIDDEN = 16

    root = jax.random.PRNGKey(0)
    k_img, k_code, k_par = jax.random.split(root, 3)

    imgs = jax.random.normal(k_img, (N, CIN, H, W), jnp.float32)
    writer_code = jax.random.normal(k_code, (N, WRITER_CODE_SIZE), jnp.float32)
    params = make_params(k_par, CIN, C1, W, WRITER_CODE_SIZE, ADAPT_HIDDEN)

    fwd = jax.jit(writer_adaptive_resnet_forward)
    out = fwd(imgs, writer_code, params)
    jax.block_until_ready(out)

    assert out.shape == (N, C1, H, W), out.shape
    assert bool(jnp.all(jnp.isfinite(out)))

    ref = reference_forward(imgs, writer_code, params)
    assert bool(jnp.allclose(out, ref, atol=2e-3, rtol=2e-3)), \
        float(jnp.max(jnp.abs(out - ref)))

    print("KERNEL_OK")
</pallas_src>

<mosaic_0001>
module attributes {stable_mosaic.version = 11 : i64} {
  func.func @_fused_forward_kernel(%arg0: i32, %arg1: memref<2x16x64xf32, #tpu.memory_space<vmem>>, %arg2: memref<2x32xf32, #tpu.memory_space<vmem>>, %arg3: memref<3x64x128xf32, #tpu.memory_space<vmem>>, %arg4: memref<3x128x128xf32, #tpu.memory_space<vmem>>, %arg5: memref<3x128x128xf32, #tpu.memory_space<vmem>>, %arg6: memref<32x48xf32, #tpu.memory_space<vmem>>, %arg7: memref<1x48xf32, #tpu.memory_space<vmem>>, %arg8: memref<48x48xf32, #tpu.memory_space<vmem>>, %arg9: memref<1x48xf32, #tpu.memory_space<vmem>>, %arg10: memref<3x8xf32, #tpu.memory_space<vmem>>, %arg11: memref<3x8xf32, #tpu.memory_space<vmem>>, %arg12: memref<128x8xf32, #tpu.memory_space<vmem>>, %arg13: memref<8x128xf32, #tpu.memory_space<vmem>>, %arg14: memref<2x16x128xf32, #tpu.memory_space<vmem>>, %arg15: memref<2x18x64xf32, #tpu.memory_space<vmem>>, %arg16: memref<2x18x128xf32, #tpu.memory_space<vmem>>) attributes {dimension_semantics = [#tpu.dimension_semantics<arbitrary>], iteration_bounds = array<i64: 1>, scalar_prefetch = 0 : i64, scratch_operands = 2 : i64, tpu.core_type = #tpu.core_type<tc>, window_params = [{pipeline_mode = #tpu.pipeline_mode<synchronous>, transform_indices = @transform_0, window_bounds = array<i64: 2, 16, 64>}, {pipeline_mode = #tpu.pipeline_mode<synchronous>, transform_indices = @transform_1, window_bounds = array<i64: 2, 32>}, {pipeline_mode = #tpu.pipeline_mode<synchronous>, transform_indices = @transform_2, window_bounds = array<i64: 3, 64, 128>}, {pipeline_mode = #tpu.pipeline_mode<synchronous>, transform_indices = @transform_3, window_bounds = array<i64: 3, 128, 128>}, {pipeline_mode = #tpu.pipeline_mode<synchronous>, transform_indices = @transform_4, window_bounds = array<i64: 3, 128, 128>}, {pipeline_mode = #tpu.pipeline_mode<synchronous>, transform_indices = @transform_5, window_bounds = array<i64: 32, 48>}, {pipeline_mode = #tpu.pipeline_mode<synchronous>, transform_indices = @transform_6, window_bounds = array<i64: 1, 48>}, {pipeline_mode = #tpu.pipeline_mode<synchronous>, transform_indices = @transform_7, window_bounds = array<i64: 48, 48>}, {pipeline_mode = #tpu.pipeline_mode<synchronous>, transform_indices = @transform_8, window_bounds = array<i64: 1, 48>}, {pipeline_mode = #tpu.pipeline_mode<synchronous>, transform_indices = @transform_9, window_bounds = array<i64: 3, 8>}, {pipeline_mode = #tpu.pipeline_mode<synchronous>, transform_indices = @transform_10, window_bounds = array<i64: 3, 8>}, {pipeline_mode = #tpu.pipeline_mode<synchronous>, transform_indices = @transform_11, window_bounds = array<i64: 128, 8>}, {pipeline_mode = #tpu.pipeline_mode<synchronous>, transform_indices = @transform_12, window_bounds = array<i64: 8, 128>}, {pipeline_mode = #tpu.pipeline_mode<synchronous>, transform_indices = @transform_13, window_bounds = array<i64: 2, 16, 128>}]} {
    %c0 = arith.constant 0 : index
    %c0_0 = arith.constant 0 : index
    %0 = vector.load %arg2[%c0, %c0_0] : memref<2x32xf32, #tpu.memory_space<vmem>>, vector<2x32xf32>
    %c0_1 = arith.constant 0 : index
    %c0_2 = arith.constant 0 : index
    %1 = vector.load %arg6[%c0_1, %c0_2] : memref<32x48xf32, #tpu.memory_space<vmem>>, vector<32x48xf32>
    %cst = arith.constant dense<0.000000e+00> : vector<2x48xf32>
    %2 = tpu.matmul %0, %1, %cst {dimension_numbers = #tpu.dot_dimension_numbers<[1], [0], [0], [1], [0, 0, 1, 1], [], []>} : vector<2x32xf32>, vector<32x48xf32>, vector<2x48xf32> -> vector<2x48xf32>
    %c0_3 = arith.constant 0 : index
    %c0_4 = arith.constant 0 : index
    %3 = vector.load %arg7[%c0_3, %c0_4] : memref<1x48xf32, #tpu.memory_space<vmem>>, vector<1x48xf32>
    %4 = vector.broadcast %3 : vector<1x48xf32> to vector<2x48xf32>
    %5 = arith.addf %2, %4 : vector<2x48xf32>
    %cst_5 = arith.constant 0.000000e+00 : f32
    %6 = vector.broadcast %cst_5 : f32 to vector<2x48xf32>
    %7 = arith.maximumf %5, %6 : vector<2x48xf32>
    %c0_6 = arith.constant 0 : index
    %c0_7 = arith.constant 0 : index
    %8 = vector.load %arg8[%c0_6, %c0_7] : memref<48x48xf32, #tpu.memory_space<vmem>>, vector<48x48xf32>
    %cst_8 = arith.constant dense<0.000000e+00> : vector<2x48xf32>
    %9 = tpu.matmul %7, %8, %cst_8 {dimension_numbers = #tpu.dot_dimension_numbers<[1], [0], [0], [1], [0, 0, 1, 1], [], []>} : vector<2x48xf32>, vector<48x48xf32>, vector<2x48xf32> -> vector<2x48xf32>
    %c0_9 = arith.constant 0 : index
    %c0_10 = arith.constant 0 : index
    %10 = vector.load %arg9[%c0_9, %c0_10] : memref<1x48xf32, #tpu.memory_space<vmem>>, vector<1x48xf32>
    %11 = vector.broadcast %10 : vector<1x48xf32> to vector<2x48xf32>
    %12 = arith.addf %9, %11 : vector<2x48xf32>
    %c0_11 = arith.constant 0 : index
    %c0_12 = arith.constant 0 : index
    %13 = vector.load %arg12[%c0_11, %c0_12] : memref<128x8xf32, #tpu.memory_space<vmem>>, vector<128x8xf32>
    %c0_13 = arith.constant 0 : index
    %c0_14 = arith.constant 0 : index
    %14 = vector.load %arg13[%c0_13, %c0_14] : memref<8x128xf32, #tpu.memory_space<vmem>>, vector<8x128xf32>
    %c0_15 = arith.constant 0 : index
    %c0_16 = arith.constant 0 : index
    %15 = vector.load %arg10[%c0_15, %c0_16] : memref<3x8xf32, #tpu.memory_space<vmem>>, vector<3x8xf32>
    %c0_17 = arith.constant 0 : index
    %c0_18 = arith.constant 0 : index
    %16 = vector.load %arg11[%c0_17, %c0_18] : memref<3x8xf32, #tpu.memory_space<vmem>>, vector<3x8xf32>
    %cst_19 = arith.constant 0.000000e+00 : f32
    %17 = vector.broadcast %cst_19 : f32 to vector<2x18x64xf32>
    %c0_20 = arith.constant 0 : index
    %c0_21 = arith.constant 0 : index
    %c0_22 = arith.constant 0 : index
    %18 = vector.load %arg15[%c0_20, %c0_21, %c0_22] : memref<2x18x64xf32, #tpu.memory_space<vmem>>, vector<2x18x64xf32>
    tpu.vector_store %arg15[%c0_20, %c0_21, %c0_22], %17 {strides = array<i32>} : memref<2x18x64xf32, #tpu.memory_space<vmem>>, vector<2x18x64xf32>,
    %cst_23 = arith.constant 0.000000e+00 : f32
    %19 = vector.broadcast %cst_23 : f32 to vector<2x18x128xf32>
    %c0_24 = arith.constant 0 : index
    %c0_25 = arith.constant 0 : index
    %c0_26 = arith.constant 0 : index
    %20 = vector.load %arg16[%c0_24, %c0_25, %c0_26] : memref<2x18x128xf32, #tpu.memory_space<vmem>>, vector<2x18x128xf32>
    tpu.vector_store %arg16[%c0_24, %c0_25, %c0_26], %19 {strides = array<i32>} : memref<2x18x128xf32, #tpu.memory_space<vmem>>, vector<2x18x128xf32>,
    %c0_27 = arith.constant 0 : index
    %c0_28 = arith.constant 0 : index
    %c0_29 = arith.constant 0 : index
    %21 = vector.load %arg1[%c0_27, %c0_28, %c0_29] : memref<2x16x64xf32, #tpu.memory_space<vmem>>, vector<2x16x64xf32>
    %c0_30 = arith.constant 0 : index
    %c1 = arith.constant 1 : index
    %c0_31 = arith.constant 0 : index
    %22 = vector.load %arg15[%c0_30, %c1, %c0_31] : memref<2x18x64xf32, #tpu.memory_space<vmem>>, vector<2x16x64xf32>
    tpu.vector_store %arg15[%c0_30, %c1, %c0_31], %21 {strides = array<i32>} : memref<2x18x64xf32, #tpu.memory_space<vmem>>, vector<2x16x64xf32>,
    %cst_32 = arith.constant 0.000000e+00 : f32
    %23 = vector.broadcast %cst_32 : f32 to vector<32x128xf32>
    %c0_33 = arith.constant 0 : index
    %c0_34 = arith.constant 0 : index
    %c0_35 = arith.constant 0 : index
    %24 = vector.load %arg15[%c0_33, %c0_34, %c0_35] : memref<2x18x64xf32, #tpu.memory_space<vmem>>, vector<2x16x64xf32>
    %25 = vector.shape_cast %24 : vector<2x16x64xf32> to vector<32x64xf32>
    %c0_36 = arith.constant 0 : index
    %c0_37 = arith.constant 0 : index
    %c0_38 = arith.constant 0 : index
    %26 = vector.load %arg3[%c0_36, %c0_37, %c0_38] : memref<3x64x128xf32, #tpu.memory_space<vmem>>, vector<1x64x128xf32>
    %27 = vector.shape_cast %26 : vector<1x64x128xf32> to vector<64x128xf32>
    %cst_39 = arith.constant dense<0.000000e+00> : vector<32x128xf32>
    %28 = tpu.matmul %25, %27, %cst_39 {dimension_numbers = #tpu.dot_dimension_numbers<[1], [0], [0], [1], [0, 0, 1, 1], [], []>} : vector<32x64xf32>, vector<64x128xf32>, vector<32x128xf32> -> vector<32x128xf32>
    %29 = arith.addf %23, %28 : vector<32x128xf32>
    %c0_40 = arith.constant 0 : index
    %c1_41 = arith.constant 1 : index
    %c0_42 = arith.constant 0 : index
    %30 = vector.load %arg15[%c0_40, %c1_41, %c0_42] : memref<2x18x64xf32, #tpu.memory_space<vmem>>, vector<2x16x64xf32>
    %31 = vector.shape_cast %30 : vector<2x16x64xf32> to vector<32x64xf32>
    %c1_43 = arith.constant 1 : index
    %c0_44 = arith.constant 0 : index
    %c0_45 = arith.constant 0 : index
    %32 = vector.load %arg3[%c1_43, %c0_44, %c0_45] : memref<3x64x128xf32, #tpu.memory_space<vmem>>, vector<1x64x128xf32>
    %33 = vector.shape_cast %32 : vector<1x64x128xf32> to vector<64x128xf32>
    %cst_46 = arith.constant dense<0.000000e+00> : vector<32x128xf32>
    %34 = tpu.matmul %31, %33, %cst_46 {dimension_numbers = #tpu.dot_dimension_numbers<[1], [0], [0], [1], [0, 0, 1, 1], [], []>} : vector<32x64xf32>, vector<64x128xf32>, vector<32x128xf32> -> vector<32x128xf32>
    %35 = arith.addf %29, %34 : vector<32x128xf32>
    %c0_47 = arith.constant 0 : index
    %c2 = arith.constant 2 : index
    %c0_48 = arith.constant 0 : index
    %36 = vector.load %arg15[%c0_47, %c2, %c0_48] : memref<2x18x64xf32, #tpu.memory_space<vmem>>, vector<2x16x64xf32>
    %37 = vector.shape_cast %36 : vector<2x16x64xf32> to vector<32x64xf32>
    %c2_49 = arith.constant 2 : index
    %c0_50 = arith.constant 0 : index
    %c0_51 = arith.constant 0 : index
    %38 = vector.load %arg3[%c2_49, %c0_50, %c0_51] : memref<3x64x128xf32, #tpu.memory_space<vmem>>, vector<1x64x128xf32>
    %39 = vector.shape_cast %38 : vector<1x64x128xf32> to vector<64x128xf32>
    %cst_52 = arith.constant dense<0.000000e+00> : vector<32x128xf32>
    %40 = tpu.matmul %37, %39, %cst_52 {dimension_numbers = #tpu.dot_dimension_numbers<[1], [0], [0], [1], [0, 0, 1, 1], [], []>} : vector<32x64xf32>, vector<64x128xf32>, vector<32x128xf32> -> vector<32x128xf32>
    %41 = arith.addf %35, %40 : vector<32x128xf32>
    %cst_53 = arith.constant dense<0.000000e+00> : vector<128xf32>
    %42 = vector.multi_reduction <add>, %41, %cst_53 [0] : vector<32x128xf32> to vector<128xf32>
    %43 = vector.shape_cast %42 : vector<128xf32> to vector<1x128xf32>
    %cst_54 = arith.constant dense<0.000000e+00> : vector<1x8xf32>
    %44 = tpu.matmul %43, %13, %cst_54 {dimension_numbers = #tpu.dot_dimension_numbers<[1], [0], [0], [1], [0, 0, 1, 1], [], []>} : vector<1x128xf32>, vector<128x8xf32>, vector<1x8xf32> -> vector<1x8xf32>
    %cst_55 = arith.constant 5.120000e+02 : f32
    %45 = vector.broadcast %cst_55 : f32 to vector<1x8xf32>
    %46 = arith.divf %44, %45 : vector<1x8xf32>
    %cst_56 = arith.constant dense<0.000000e+00> : vector<1x128xf32>
    %47 = tpu.matmul %46, %14, %cst_56 {dimension_numbers = #tpu.dot_dimension_numbers<[1], [0], [0], [1], [0, 0, 1, 1], [], []>} : vector<1x8xf32>, vector<8x128xf32>, vector<1x128xf32> -> vector<1x128xf32>
    %48 = vector.broadcast %47 : vector<1x128xf32> to vector<32x128xf32>
    %49 = arith.subf %41, %48 : vector<32x128xf32>
    %50 = arith.mulf %49, %49 : vector<32x128xf32>
    %cst_57 = arith.constant dense<0.000000e+00> : vector<128xf32>
    %51 = vector.multi_reduction <add>, %50, %cst_57 [0] : vector<32x128xf32> to vector<128xf32>
    %52 = vector.shape_cast %51 : vector<128xf32> to vector<1x128xf32>
    %cst_58 = arith.constant dense<0.000000e+00> : vector<1x8xf32>
    %53 = tpu.matmul %52, %13, %cst_58 {dimension_numbers = #tpu.dot_dimension_numbers<[1], [0], [0], [1], [0, 0, 1, 1], [], []>} : vector<1x128xf32>, vector<128x8xf32>, vector<1x8xf32> -> vector<1x8xf32>
    %cst_59 = arith.constant 5.120000e+02 : f32
    %54 = vector.broadcast %cst_59 : f32 to vector<1x8xf32>
    %55 = arith.divf %53, %54 : vector<1x8xf32>
    %cst_60 = arith.constant 9.99999974E-6 : f32
    %56 = vector.broadcast %cst_60 : f32 to vector<1x8xf32>
    %57 = arith.addf %55, %56 : vector<1x8xf32>
    %58 = math.rsqrt %57 : vector<1x8xf32>
    %59 = vector.extract_strided_slice %12 {offsets = [0, 0], sizes = [2, 16], strides = [1, 1]} : vector<2x48xf32> to vector<2x16xf32>
    %60 = vector.extract_strided_slice %15 {offsets = [0, 0], sizes = [1, 8], strides = [1, 1]} : vector<3x8xf32> to vector<1x8xf32>
    %61 = vector.extract_strided_slice %59 {offsets = [0, 0], sizes = [2, 8], strides = [1, 1]} : vector<2x16xf32> to vector<2x8xf32>
    %62 = vector.broadcast %60 : vector<1x8xf32> to vector<2x8xf32>
    %63 = arith.addf %62, %61 : vector<2x8xf32>
    %64 = vector.extract_strided_slice %16 {offsets = [0, 0], sizes = [1, 8], strides = [1, 1]} : vector<3x8xf32> to vector<1x8xf32>
    %65 = vector.extract_strided_slice %59 {offsets = [0, 8], sizes = [2, 8], strides = [1, 1]} : vector<2x16xf32> to vector<2x8xf32>
    %66 = vector.broadcast %64 : vector<1x8xf32> to vector<2x8xf32>
    %67 = arith.addf %66, %65 : vector<2x8xf32>
    %68 = vector.broadcast %58 : vector<1x8xf32> to vector<2x8xf32>
    %69 = arith.mulf %63, %68 : vector<2x8xf32>
    %70 = vector.broadcast %46 : vector<1x8xf32> to vector<2x8xf32>
    %71 = arith.mulf %69, %70 : vector<2x8xf32>
    %72 = arith.subf %67, %71 : vector<2x8xf32>
    %cst_61 = arith.constant dense<0.000000e+00> : vector<2x128xf32>
    %73 = tpu.matmul %69, %14, %cst_61 {dimension_numbers = #tpu.dot_dimension_numbers<[1], [0], [0], [1], [0, 0, 1, 1], [], []>} : vector<2x8xf32>, vector<8x128xf32>, vector<2x128xf32> -> vector<2x128xf32>
    %cst_62 = arith.constant dense<0.000000e+00> : vector<2x128xf32>
    %74 = tpu.matmul %72, %14, %cst_62 {dimension_numbers = #tpu.dot_dimension_numbers<[1], [0], [0], [1], [0, 0, 1, 1], [], []>} : vector<2x8xf32>, vector<8x128xf32>, vector<2x128xf32> -> vector<2x128xf32>
    %75 = vector.shape_cast %41 : vector<32x128xf32> to vector<2x16x128xf32>
    %76 = vector.shape_cast %73 : vector<2x128xf32> to vector<2x1x128xf32>
    %77 = vector.broadcast %76 : vector<2x1x128xf32> to vector<2x16x128xf32>
    %78 = arith.mulf %75, %77 : vector<2x16x128xf32>
    %79 = vector.shape_cast %74 : vector<2x128xf32> to vector<2x1x128xf32>
    %80 = vector.broadcast %79 : vector<2x1x128xf32> to vector<2x16x128xf32>
    %81 = arith.addf %78, %80 : vector<2x16x128xf32>
    %cst_63 = arith.constant 0.000000e+00 : f32
    %82 = vector.broadcast %cst_63 : f32 to vector<2x16x128xf32>
    %83 = arith.maximumf %81, %82 : vector<2x16x128xf32>
    %84 = vector.shape_cast %83 : vector<2x16x128xf32> to vector<32x128xf32>
    %85 = vector.shape_cast %84 : vector<32x128xf32> to vector<2x16x128xf32>
    %c0_64 = arith.constant 0 : index
    %c1_65 = arith.constant 1 : index
    %c0_66 = arith.constant 0 : index
    %86 = vector.load %arg16[%c0_64, %c1_65, %c0_66] : memref<2x18x128xf32, #tpu.memory_space<vmem>>, vector<2x16x128xf32>
    tpu.vector_store %arg16[%c0_64, %c1_65, %c0_66], %85 {strides = array<i32>} : memref<2x18x128xf32, #tpu.memory_space<vmem>>, vector<2x16x128xf32>,
    %cst_67 = arith.constant 0.000000e+00 : f32
    %87 = vector.broadcast %cst_67 : f32 to vector<32x128xf32>
    %c0_68 = arith.constant 0 : index
    %c0_69 = arith.constant 0 : index
    %c0_70 = arith.constant 0 : index
    %88 = vector.load %arg16[%c0_68, %c0_69, %c0_70] : memref<2x18x128xf32, #tpu.memory_space<vmem>>, vector<2x16x128xf32>
    %89 = vector.shape_cast %88 : vector<2x16x128xf32> to vector<32x128xf32>
    %c0_71 = arith.constant 0 : index
    %c0_72 = arith.constant 0 : index
    %c0_73 = arith.constant 0 : index
    %90 = vector.load %arg4[%c0_71, %c0_72, %c0_73] : memref<3x128x128xf32, #tpu.memory_space<vmem>>, vector<1x128x128xf32>
    %91 = vector.shape_cast %90 : vector<1x128x128xf32> to vector<128x128xf32>
    %cst_74 = arith.constant dense<0.000000e+00> : vector<32x128xf32>
    %92 = tpu.matmul %89, %91, %cst_74 {dimension_numbers = #tpu.dot_dimension_numbers<[1], [0], [0], [1], [0, 0, 1, 1], [], []>} : vector<32x128xf32>, vector<128x128xf32>, vector<32x128xf32> -> vector<32x128xf32>
    %93 = arith.addf %87, %92 : vector<32x128xf32>
    %c0_75 = arith.constant 0 : index
    %c1_76 = arith.constant 1 : index
    %c0_77 = arith.constant 0 : index
    %94 = vector.load %arg16[%c0_75, %c1_76, %c0_77] : memref<2x18x128xf32, #tpu.memory_space<vmem>>, vector<2x16x128xf32>
    %95 = vector.shape_cast %94 : vector<2x16x128xf32> to vector<32x128xf32>
    %c1_78 = arith.constant 1 : index
    %c0_79 = arith.constant 0 : index
    %c0_80 = arith.constant 0 : index
    %96 = vector.load %arg4[%c1_78, %c0_79, %c0_80] : memref<3x128x128xf32, #tpu.memory_space<vmem>>, vector<1x128x128xf32>
    %97 = vector.shape_cast %96 : vector<1x128x128xf32> to vector<128x128xf32>
    %cst_81 = arith.constant dense<0.000000e+00> : vector<32x128xf32>
    %98 = tpu.matmul %95, %97, %cst_81 {dimension_numbers = #tpu.dot_dimension_numbers<[1], [0], [0], [1], [0, 0, 1, 1], [], []>} : vector<32x128xf32>, vector<128x128xf32>, vector<32x128xf32> -> vector<32x128xf32>
    %99 = arith.addf %93, %98 : vector<32x128xf32>
    %c0_82 = arith.constant 0 : index
    %c2_83 = arith.constant 2 : index
    %c0_84 = arith.constant 0 : index
    %100 = vector.load %arg16[%c0_82, %c2_83, %c0_84] : memref<2x18x128xf32, #tpu.memory_space<vmem>>, vector<2x16x128xf32>
    %101 = vector.shape_cast %100 : vector<2x16x128xf32> to vector<32x128xf32>
    %c2_85 = arith.constant 2 : index
    %c0_86 = arith.constant 0 : index
    %c0_87 = arith.constant 0 : index
    %102 = vector.load %arg4[%c2_85, %c0_86, %c0_87] : memref<3x128x128xf32, #tpu.memory_space<vmem>>, vector<1x128x128xf32>
    %103 = vector.shape_cast %102 : vector<1x128x128xf32> to vector<128x128xf32>
    %cst_88 = arith.constant dense<0.000000e+00> : vector<32x128xf32>
    %104 = tpu.matmul %101, %103, %cst_88 {dimension_numbers = #tpu.dot_dimension_numbers<[1], [0], [0], [1], [0, 0, 1, 1], [], []>} : vector<32x128xf32>, vector<128x128xf32>, vector<32x128xf32> -> vector<32x128xf32>
    %105 = arith.addf %99, %104 : vector<32x128xf32>
    %cst_89 = arith.constant dense<0.000000e+00> : vector<128xf32>
    %106 = vector.multi_reduction <add>, %105, %cst_89 [0] : vector<32x128xf32> to vector<128xf32>
    %107 = vector.shape_cast %106 : vector<128xf32> to vector<1x128xf32>
    %cst_90 = arith.constant dense<0.000000e+00> : vector<1x8xf32>
    %108 = tpu.matmul %107, %13, %cst_90 {dimension_numbers = #tpu.dot_dimension_numbers<[1], [0], [0], [1], [0, 0, 1, 1], [], []>} : vector<1x128xf32>, vector<128x8xf32>, vector<1x8xf32> -> vector<1x8xf32>
    %cst_91 = arith.constant 5.120000e+02 : f32
    %109 = vector.broadcast %cst_91 : f32 to vector<1x8xf32>
    %110 = arith.divf %108, %109 : vector<1x8xf32>
    %cst_92 = arith.constant dense<0.000000e+00> : vector<1x128xf32>
    %111 = tpu.matmul %110, %14, %cst_92 {dimension_numbers = #tpu.dot_dimension_numbers<[1], [0], [0], [1], [0, 0, 1, 1], [], []>} : vector<1x8xf32>, vector<8x128xf32>, vector<1x128xf32> -> vector<1x128xf32>
    %112 = vector.broadcast %111 : vector<1x128xf32> to vector<32x128xf32>
    %113 = arith.subf %105, %112 : vector<32x128xf32>
    %114 = arith.mulf %113, %113 : vector<32x128xf32>
    %cst_93 = arith.constant dense<0.000000e+00> : vector<128xf32>
    %115 = vector.multi_reduction <add>, %114, %cst_93 [0] : vector<32x128xf32> to vector<128xf32>
    %116 = vector.shape_cast %115 : vector<128xf32> to vector<1x128xf32>
    %cst_94 = arith.constant dense<0.000000e+00> : vector<1x8xf32>
    %117 = tpu.matmul %116, %13, %cst_94 {dimension_numbers = #tpu.dot_dimension_numbers<[1], [0], [0], [1], [0, 0, 1, 1], [], []>} : vector<1x128xf32>, vector<128x8xf32>, vector<1x8xf32> -> vector<1x8xf32>
    %cst_95 = arith.constant 5.120000e+02 : f32
    %118 = vector.broadcast %cst_95 : f32 to vector<1x8xf32>
    %119 = arith.divf %117, %118 : vector<1x8xf32>
    %cst_96 = arith.constant 9.99999974E-6 : f32
    %120 = vector.broadcast %cst_96 : f32 to vector<1x8xf32>
    %121 = arith.addf %119, %120 : vector<1x8xf32>
    %122 = math.rsqrt %121 : vector<1x8xf32>
    %123 = vector.extract_strided_slice %12 {offsets = [0, 16], sizes = [2, 16], strides = [1, 1]} : vector<2x48xf32> to vector<2x16xf32>
    %124 = vector.extract_strided_slice %15 {offsets = [1, 0], sizes = [1, 8], strides = [1, 1]} : vector<3x8xf32> to vector<1x8xf32>
    %125 = vector.extract_strided_slice %123 {offsets = [0, 0], sizes = [2, 8], strides = [1, 1]} : vector<2x16xf32> to vector<2x8xf32>
    %126 = vector.broadcast %124 : vector<1x8xf32> to vector<2x8xf32>
    %127 = arith.addf %126, %125 : vector<2x8xf32>
    %128 = vector.extract_strided_slice %16 {offsets = [1, 0], sizes = [1, 8], strides = [1, 1]} : vector<3x8xf32> to vector<1x8xf32>
    %129 = vector.extract_strided_slice %123 {offsets = [0, 8], sizes = [2, 8], strides = [1, 1]} : vector<2x16xf32> to vector<2x8xf32>
    %130 = vector.broadcast %128 : vector<1x8xf32> to vector<2x8xf32>
    %131 = arith.addf %130, %129 : vector<2x8xf32>
    %132 = vector.broadcast %122 : vector<1x8xf32> to vector<2x8xf32>
    %133 = arith.mulf %127, %132 : vector<2x8xf32>
    %134 = vector.broadcast %110 : vector<1x8xf32> to vector<2x8xf32>
    %135 = arith.mulf %133, %134 : vector<2x8xf32>
    %136 = arith.subf %131, %135 : vector<2x8xf32>
    %cst_97 = arith.constant dense<0.000000e+00> : vector<2x128xf32>
    %137 = tpu.matmul %133, %14, %cst_97 {dimension_numbers = #tpu.dot_dimension_numbers<[1], [0], [0], [1], [0, 0, 1, 1], [], []>} : vector<2x8xf32>, vector<8x128xf32>, vector<2x128xf32> -> vector<2x128xf32>
    %cst_98 = arith.constant dense<0.000000e+00> : vector<2x128xf32>
    %138 = tpu.matmul %136, %14, %cst_98 {dimension_numbers = #tpu.dot_dimension_numbers<[1], [0], [0], [1], [0, 0, 1, 1], [], []>} : vector<2x8xf32>, vector<8x128xf32>, vector<2x128xf32> -> vector<2x128xf32>
    %139 = vector.shape_cast %105 : vector<32x128xf32> to vector<2x16x128xf32>
    %140 = vector.shape_cast %137 : vector<2x128xf32> to vector<2x1x128xf32>
    %141 = vector.broadcast %140 : vector<2x1x128xf32> to vector<2x16x128xf32>
    %142 = arith.mulf %139, %141 : vector<2x16x128xf32>
    %143 = vector.shape_cast %138 : vector<2x128xf32> to vector<2x1x128xf32>
    %144 = vector.broadcast %143 : vector<2x1x128xf32> to vector<2x16x128xf32>
    %145 = arith.addf %142, %144 : vector<2x16x128xf32>
    %cst_99 = arith.constant 0.000000e+00 : f32
    %146 = vector.broadcast %cst_99 : f32 to vector<2x16x128xf32>
    %147 = arith.maximumf %145, %146 : vector<2x16x128xf32>
    %148 = vector.shape_cast %147 : vector<2x16x128xf32> to vector<32x128xf32>
    %149 = vector.shape_cast %148 : vector<32x128xf32> to vector<2x16x128xf32>
    %c0_100 = arith.constant 0 : index
    %c1_101 = arith.constant 1 : index
    %c0_102 = arith.constant 0 : index
    %150 = vector.load %arg16[%c0_100, %c1_101, %c0_102] : memref<2x18x128xf32, #tpu.memory_space<vmem>>, vector<2x16x128xf32>
    tpu.vector_store %arg16[%c0_100, %c1_101, %c0_102], %149 {strides = array<i32>} : memref<2x18x128xf32, #tpu.memory_space<vmem>>, vector<2x16x128xf32>,
    %cst_103 = arith.constant 0.000000e+00 : f32
    %151 = vector.broadcast %cst_103 : f32 to vector<32x128xf32>
    %c0_104 = arith.constant 0 : index
    %c0_105 = arith.constant 0 : index
    %c0_106 = arith.constant 0 : index
    %152 = vector.load %arg16[%c0_104, %c0_105, %c0_106] : memref<2x18x128xf32, #tpu.memory_space<vmem>>, vector<2x16x128xf32>
    %153 = vector.shape_cast %152 : vector<2x16x128xf32> to vector<32x128xf32>
    %c0_107 = arith.constant 0 : index
    %c0_108 = arith.constant 0 : index
    %c0_109 = arith.constant 0 : index
    %154 = vector.load %arg5[%c0_107, %c0_108, %c0_109] : memref<3x128x128xf32, #tpu.memory_space<vmem>>, vector<1x128x128xf32>
    %155 = vector.shape_cast %154 : vector<1x128x128xf32> to vector<128x128xf32>
    %cst_110 = arith.constant dense<0.000000e+00> : vector<32x128xf32>
    %156 = tpu.matmul %153, %155, %cst_110 {dimension_numbers = #tpu.dot_dimension_numbers<[1], [0], [0], [1], [0, 0, 1, 1], [], []>} : vector<32x128xf32>, vector<128x128xf32>, vector<32x128xf32> -> vector<32x128xf32>
    %157 = arith.addf %151, %156 : vector<32x128xf32>
    %c0_111 = arith.constant 0 : index
    %c1_112 = arith.constant 1 : index
    %c0_113 = arith.constant 0 : index
    %158 = vector.load %arg16[%c0_111, %c1_112, %c0_113] : memref<2x18x128xf32, #tpu.memory_space<vmem>>, vector<2x16x128xf32>
    %159 = vector.shape_cast %158 : vector<2x16x128xf32> to vector<32x128xf32>
    %c1_114 = arith.constant 1 : index
    %c0_115 = arith.constant 0 : index
    %c0_116 = arith.constant 0 : index
    %160 = vector.load %arg5[%c1_114, %c0_115, %c0_116] : memref<3x128x128xf32, #tpu.memory_space<vmem>>, vector<1x128x128xf32>
    %161 = vector.shape_cast %160 : vector<1x128x128xf32> to vector<128x128xf32>
    %cst_117 = arith.constant dense<0.000000e+00> : vector<32x128xf32>
    %162 = tpu.matmul %159, %161, %cst_117 {dimension_numbers = #tpu.dot_dimension_numbers<[1], [0], [0], [1], [0, 0, 1, 1], [], []>} : vector<32x128xf32>, vector<128x128xf32>, vector<32x128xf32> -> vector<32x128xf32>
    %163 = arith.addf %157, %162 : vector<32x128xf32>
    %c0_118 = arith.constant 0 : index
    %c2_119 = arith.constant 2 : index
    %c0_120 = arith.constant 0 : index
    %164 = vector.load %arg16[%c0_118, %c2_119, %c0_120] : memref<2x18x128xf32, #tpu.memory_space<vmem>>, vector<2x16x128xf32>
    %165 = vector.shape_cast %164 : vector<2x16x128xf32> to vector<32x128xf32>
    %c2_121 = arith.constant 2 : index
    %c0_122 = arith.constant 0 : index
    %c0_123 = arith.constant 0 : index
    %166 = vector.load %arg5[%c2_121, %c0_122, %c0_123] : memref<3x128x128xf32, #tpu.memory_space<vmem>>, vector<1x128x128xf32>
    %167 = vector.shape_cast %166 : vector<1x128x128xf32> to vector<128x128xf32>
    %cst_124 = arith.constant dense<0.000000e+00> : vector<32x128xf32>
    %168 = tpu.matmul %165, %167, %cst_124 {dimension_numbers = #tpu.dot_dimension_numbers<[1], [0], [0], [1], [0, 0, 1, 1], [], []>} : vector<32x128xf32>, vector<128x128xf32>, vector<32x128xf32> -> vector<32x128xf32>
    %169 = arith.addf %163, %168 : vector<32x128xf32>
    %cst_125 = arith.constant dense<0.000000e+00> : vector<128xf32>
    %170 = vector.multi_reduction <add>, %169, %cst_125 [0] : vector<32x128xf32> to vector<128xf32>
    %171 = vector.shape_cast %170 : vector<128xf32> to vector<1x128xf32>
    %cst_126 = arith.constant dense<0.000000e+00> : vector<1x8xf32>
    %172 = tpu.matmul %171, %13, %cst_126 {dimension_numbers = #tpu.dot_dimension_numbers<[1], [0], [0], [1], [0, 0, 1, 1], [], []>} : vector<1x128xf32>, vector<128x8xf32>, vector<1x8xf32> -> vector<1x8xf32>
    %cst_127 = arith.constant 5.120000e+02 : f32
    %173 = vector.broadcast %cst_127 : f32 to vector<1x8xf32>
    %174 = arith.divf %172, %173 : vector<1x8xf32>
    %cst_128 = arith.constant dense<0.000000e+00> : vector<1x128xf32>
    %175 = tpu.matmul %174, %14, %cst_128 {dimension_numbers = #tpu.dot_dimension_numbers<[1], [0], [0], [1], [0, 0, 1, 1], [], []>} : vector<1x8xf32>, vector<8x128xf32>, vector<1x128xf32> -> vector<1x128xf32>
    %176 = vector.broadcast %175 : vector<1x128xf32> to vector<32x128xf32>
    %177 = arith.subf %169, %176 : vector<32x128xf32>
    %178 = arith.mulf %177, %177 : vector<32x128xf32>
    %cst_129 = arith.constant dense<0.000000e+00> : vector<128xf32>
    %179 = vector.multi_reduction <add>, %178, %cst_129 [0] : vector<32x128xf32> to vector<128xf32>
    %180 = vector.shape_cast %179 : vector<128xf32> to vector<1x128xf32>
    %cst_130 = arith.constant dense<0.000000e+00> : vector<1x8xf32>
    %181 = tpu.matmul %180, %13, %cst_130 {dimension_numbers = #tpu.dot_dimension_numbers<[1], [0], [0], [1], [0, 0, 1, 1], [], []>} : vector<1x128xf32>, vector<128x8xf32>, vector<1x8xf32> -> vector<1x8xf32>
    %cst_131 = arith.constant 5.120000e+02 : f32
    %182 = vector.broadcast %cst_131 : f32 to vector<1x8xf32>
    %183 = arith.divf %181, %182 : vector<1x8xf32>
    %cst_132 = arith.constant 9.99999974E-6 : f32
    %184 = vector.broadcast %cst_132 : f32 to vector<1x8xf32>
    %185 = arith.addf %183, %184 : vector<1x8xf32>
    %186 = math.rsqrt %185 : vector<1x8xf32>
    %187 = vector.extract_strided_slice %12 {offsets = [0, 32], sizes = [2, 16], strides = [1, 1]} : vector<2x48xf32> to vector<2x16xf32>
    %188 = vector.extract_strided_slice %15 {offsets = [2, 0], sizes = [1, 8], strides = [1, 1]} : vector<3x8xf32> to vector<1x8xf32>
    %189 = vector.extract_strided_slice %187 {offsets = [0, 0], sizes = [2, 8], strides = [1, 1]} : vector<2x16xf32> to vector<2x8xf32>
    %190 = vector.broadcast %188 : vector<1x8xf32> to vector<2x8xf32>
    %191 = arith.addf %190, %189 : vector<2x8xf32>
    %192 = vector.extract_strided_slice %16 {offsets = [2, 0], sizes = [1, 8], strides = [1, 1]} : vector<3x8xf32> to vector<1x8xf32>
    %193 = vector.extract_strided_slice %187 {offsets = [0, 8], sizes = [2, 8], strides = [1, 1]} : vector<2x16xf32> to vector<2x8xf32>
    %194 = vector.broadcast %192 : vector<1x8xf32> to vector<2x8xf32>
    %195 = arith.addf %194, %193 : vector<2x8xf32>
    %196 = vector.broadcast %186 : vector<1x8xf32> to vector<2x8xf32>
    %197 = arith.mulf %191, %196 : vector<2x8xf32>
    %198 = vector.broadcast %174 : vector<1x8xf32> to vector<2x8xf32>
    %199 = arith.mulf %197, %198 : vector<2x8xf32>
    %200 = arith.subf %195, %199 : vector<2x8xf32>
    %cst_133 = arith.constant dense<0.000000e+00> : vector<2x128xf32>
    %201 = tpu.matmul %197, %14, %cst_133 {dimension_numbers = #tpu.dot_dimension_numbers<[1], [0], [0], [1], [0, 0, 1, 1], [], []>} : vector<2x8xf32>, vector<8x128xf32>, vector<2x128xf32> -> vector<2x128xf32>
    %cst_134 = arith.constant dense<0.000000e+00> : vector<2x128xf32>
    %202 = tpu.matmul %200, %14, %cst_134 {dimension_numbers = #tpu.dot_dimension_numbers<[1], [0], [0], [1], [0, 0, 1, 1], [], []>} : vector<2x8xf32>, vector<8x128xf32>, vector<2x128xf32> -> vector<2x128xf32>
    %203 = vector.shape_cast %169 : vector<32x128xf32> to vector<2x16x128xf32>
    %204 = vector.shape_cast %201 : vector<2x128xf32> to vector<2x1x128xf32>
    %205 = vector.broadcast %204 : vector<2x1x128xf32> to vector<2x16x128xf32>
    %206 = arith.mulf %203, %205 : vector<2x16x128xf32>
    %207 = vector.shape_cast %202 : vector<2x128xf32> to vector<2x1x128xf32>
    %208 = vector.broadcast %207 : vector<2x1x128xf32> to vector<2x16x128xf32>
    %209 = arith.addf %206, %208 : vector<2x16x128xf32>
    %210 = vector.shape_cast %209 : vector<2x16x128xf32> to vector<32x128xf32>
    %211 = arith.addf %210, %84 : vector<32x128xf32>
    %cst_135 = arith.constant 0.000000e+00 : f32
    %212 = vector.broadcast %cst_135 : f32 to vector<32x128xf32>
    %213 = arith.maximumf %211, %212 : vector<32x128xf32>
    %214 = vector.shape_cast %213 : vector<32x128xf32> to vector<2x16x128xf32>
    %c0_136 = arith.constant 0 : index
    %c0_137 = arith.constant 0 : index
    %c0_138 = arith.constant 0 : index
    %215 = vector.load %arg14[%c0_136, %c0_137, %c0_138] : memref<2x16x128xf32, #tpu.memory_space<vmem>>, vector<2x16x128xf32>
    tpu.vector_store %arg14[%c0_136, %c0_137, %c0_138], %214 {strides = array<i32>} : memref<2x16x128xf32, #tpu.memory_space<vmem>>, vector<2x16x128xf32>,
    return
  }
  func.func @transform_0(%arg0: i32) -> (i32, i32, i32) {
    %c0_i32 = arith.constant 0 : i32
    %c0_i32_0 = arith.constant 0 : i32
    %c0_i32_1 = arith.constant 0 : i32
    %c0_i32_2 = arith.constant 0 : i32
    return %c0_i32, %c0_i32_0, %c0_i32_1 : i32, i32, i32
  }
  func.func @transform_1(%arg0: i32) -> (i32, i32) {
    %c0_i32 = arith.constant 0 : i32
    %c0_i32_0 = arith.constant 0 : i32
    %c0_i32_1 = arith.constant 0 : i32
    return %c0_i32, %c0_i32_0 : i32, i32
  }
  func.func @transform_2(%arg0: i32) -> (i32, i32, i32) {
    %c0_i32 = arith.constant 0 : i32
    %c0_i32_0 = arith.constant 0 : i32
    %c0_i32_1 = arith.constant 0 : i32
    %c0_i32_2 = arith.constant 0 : i32
    return %c0_i32, %c0_i32_0, %c0_i32_1 : i32, i32, i32
  }
  func.func @transform_3(%arg0: i32) -> (i32, i32, i32) {
    %c0_i32 = arith.constant 0 : i32
    %c0_i32_0 = arith.constant 0 : i32
    %c0_i32_1 = arith.constant 0 : i32
    %c0_i32_2 = arith.constant 0 : i32
    return %c0_i32, %c0_i32_0, %c0_i32_1 : i32, i32, i32
  }
  func.func @transform_4(%arg0: i32) -> (i32, i32, i32) {
    %c0_i32 = arith.constant 0 : i32
    %c0_i32_0 = arith.constant 0 : i32
    %c0_i32_1 = arith.constant 0 : i32
    %c0_i32_2 = arith.constant 0 : i32
    return %c0_i32, %c0_i32_0, %c0_i32_1 : i32, i32, i32
  }
  func.func @transform_5(%arg0: i32) -> (i32, i32) {
    %c0_i32 = arith.constant 0 : i32
    %c0_i32_0 = arith.constant 0 : i32
    %c0_i32_1 = arith.constant 0 : i32
    return %c0_i32, %c0_i32_0 : i32, i32
  }
  func.func @transform_6(%arg0: i32) -> (i32, i32) {
    %c0_i32 = arith.constant 0 : i32
    %c0_i32_0 = arith.constant 0 : i32
    %c0_i32_1 = arith.constant 0 : i32
    return %c0_i32, %c0_i32_0 : i32, i32
  }
  func.func @transform_7(%arg0: i32) -> (i32, i32) {
    %c0_i32 = arith.constant 0 : i32
    %c0_i32_0 = arith.constant 0 : i32
    %c0_i32_1 = arith.constant 0 : i32
    return %c0_i32, %c0_i32_0 : i32, i32
  }
  func.func @transform_8(%arg0: i32) -> (i32, i32) {
    %c0_i32 = arith.constant 0 : i32
    %c0_i32_0 = arith.constant 0 : i32
    %c0_i32_1 = arith.constant 0 : i32
    return %c0_i32, %c0_i32_0 : i32, i32
  }
  func.func @transform_9(%arg0: i32) -> (i32, i32) {
    %c0_i32 = arith.constant 0 : i32
    %c0_i32_0 = arith.constant 0 : i32
    %c0_i32_1 = arith.constant 0 : i32
    return %c0_i32, %c0_i32_0 : i32, i32
  }
  func.func @transform_10(%arg0: i32) -> (i32, i32) {
    %c0_i32 = arith.constant 0 : i32
    %c0_i32_0 = arith.constant 0 : i32
    %c0_i32_1 = arith.constant 0 : i32
    return %c0_i32, %c0_i32_0 : i32, i32
  }
  func.func @transform_11(%arg0: i32) -> (i32, i32) {
    %c0_i32 = arith.constant 0 : i32
    %c0_i32_0 = arith.constant 0 : i32
    %c0_i32_1 = arith.constant 0 : i32
    return %c0_i32, %c0_i32_0 : i32, i32
  }
  func.func @transform_12(%arg0: i32) -> (i32, i32) {
    %c0_i32 = arith.constant 0 : i32
    %c0_i32_0 = arith.constant 0 : i32
    %c0_i32_1 = arith.constant 0 : i32
    return %c0_i32, %c0_i32_0 : i32, i32
  }
  func.func @transform_13(%arg0: i32) -> (i32, i32, i32) {
    %c0_i32 = arith.constant 0 : i32
    %c0_i32_0 = arith.constant 0 : i32
    %c0_i32_1 = arith.constant 0 : i32
    %c0_i32_2 = arith.constant 0 : i32
    return %c0_i32, %c0_i32_0, %c0_i32_1 : i32, i32, i32
  }
}

</mosaic_0001>

<bundles_post_ra>
// kernel: writer_adaptive_resnet_forward.1
= control target key start
LH: loop header
LB: loop body
LE: loop exit
PB: predicated region body
PF: predicated region fallthrough
CT: control target
= control target key end

     0   :  { %18 = vsyncpa [#allocation5], 0  ;;  %s4706_s0 = inlined_call_operand.vmem [shape: f32[2,16,64], index: 0, kind: input, shape index: {}]   ;;  %s4707_s1 = inlined_call_operand.vmem [shape: f32[2,32], index: 1, kind: input, shape index: {}]   ;;  %s4708_s2 = inlined_call_operand.hbm [shape: f32[3,64,128], index: 2, kind: input, shape index: {}]   ;;  %s4709_s3 = inlined_call_operand.vmem [shape: f32[3,128,128], index: 3, kind: input, shape index: {}]   ;;  %s4710_s4 = inlined_call_operand.hbm [shape: f32[3,128,128], index: 4, kind: input, shape index: {}]   ;;  %s4711_s5 = inlined_call_operand.vmem [shape: f32[32,48], index: 5, kind: input, shape index: {}]   ;;  %s4712_s6 = inlined_call_operand.vmem [shape: f32[1,48], index: 6, kind: input, shape index: {}]   ;;  %s4713_s7 = inlined_call_operand.vmem [shape: f32[48,48], index: 7, kind: input, shape index: {}]   ;;  %s4714_s8 = inlined_call_operand.vmem [shape: f32[1,48], index: 8, kind: input, shape index: {}]   ;;  %s4715_s9 = inlined_call_operand.vmem [shape: f32[3,8], index: 9, kind: input, shape index: {}]   ;;  %s4716_s10 = inlined_call_operand.vmem [shape: f32[3,8], index: 10, kind: input, shape index: {}]   ;;  %s4717_s11 = inlined_call_operand.vmem [shape: f32[128,8], index: 11, kind: input, shape index: {}]   ;;  %s4718_s12 = inlined_call_operand.vmem [shape: f32[8,128], index: 12, kind: input, shape index: {}]   ;;  %s4719_s13 = inlined_call_operand.vmem [shape: f32[2,16,128], index: 13, kind: output, shape index: {}]  }
   0x1   :  { %19 = vsyncpa [#allocation7], 0  ;;  %s3779_s25 = smov [#allocation4]  }
   0x2   :  { %s29_s26 = sshll.u32 %s3779_s25, 4  ;;  %s30_s26 = int_to_ptr.vmem [resolvable:$true] %s29_s26 }
   0x3   :  { %s3743_s27 = scalar_lea.vmem %s30_s26, 3072  ;;  %p3748_p1 = scmp.lt.s32.totalorder %s30_s26, %s30_s26 }
   0x4   :  { %p3744_p0 = scmp.ne.s32.totalorder %s30_s26, %s3743_s27  ;;  %p3749_p2 = scmp.lt.s32.totalorder %s3743_s27, %s3743_s27 }
   0x6   :  { %p3750_p3 = por %p3749_p2, %p3748_p1 }
   0x8   :  { %p3751_p4 = pnand %p3750_p3, %p3744_p0 }
   0xa   :  { %3754 = shalt.err (!%p3751_p4)
}
   0xb   :  { %s3780_s28 = smov 128   ;;  %s3781_s29 = smov 8  }
   0xc   :  { %35 = dma.hbm_to_vmem [thread:$0]  %s4708_s2, 3072, %s30_s26, [#allocation5], %s3780_s28, %s3780_s28, %s3781_s29  }
   0xd   :  { %s3782_s15 = smov [#allocation6]  }
   0xe   :  { %s43_s16 = sshll.u32 %s3782_s15, 4  ;;  %s44_s16 = int_to_ptr.vmem [resolvable:$true] %s43_s16 }
   0xf   :  { %s3763_s17 = scalar_lea.vmem %s44_s16, 6144  ;;  %p3768_p6 = scmp.lt.s32.totalorder %s44_s16, %s44_s16 }
  0x10   :  { %p3764_p5 = scmp.ne.s32.totalorder %s44_s16, %s3763_s17  ;;  %p3769_p7 = scmp.lt.s32.totalorder %s3763_s17, %s3763_s17 }
  0x12   :  { %p3770_p8 = por %p3769_p7, %p3768_p6 }
  0x14   :  { %p3771_p9 = pnand %p3770_p8, %p3764_p5 }
  0x16   :  { %3774 = shalt.err (!%p3771_p9)
}
  0x17   :  { %49 = dma.hbm_to_vmem [thread:$0]  %s4710_s4, 6144, %s44_s16, [#allocation7], %s3780_s28, %s3780_s28, %s3781_s29  }
  0x18   :  { %3775 = dma.done.wait [#allocation5], 3072  }
  0x19   :  { %3776 = vsyncadd [#allocation5], 4294964224 }
  0x1a   :  { %3777 = dma.done.wait [#allocation7], 6144  }
  0x1b   :  { %3778 = vsyncadd [#allocation7], 4294961152  ;;  %v3783_v0 = vmov 0.0   ;;  %vm3784_vm0 = vmmov 0   ;;  %v76_v1 = vld [vmem:[%s4711_s5 + $0x18] sm:$0xff]  ;;  %v75_v2 = vld [vmem:[%s4711_s5 + $0x10] sm:$0xff] }
  0x1c   :  { %3123 = vmatprep.subr.mxu0 %v3783_v0  ;;  %273 = vst [vmem:[#allocation3] sm:$0xff] %v3783_v0  ;;  %274 = vst [vmem:[#allocation3 + $0x8] sm:$0xff] %v3783_v0  ;;  %3131 = vmatprep.mubr.msk.f32.mxu0 %vm3784_vm0, %v3783_v0  ;;  %v74_v3 = vld [vmem:[%s4711_s5 + $0x8] sm:$0xff]  ;;  %v163_v5 = vld [vmem:[%s4713_s7 + $0x20] sm:$0xff]  ;;  %vm84_vm1 = vcmask 261120   ;;  %vm265_vm2 = vcmask 523264  }
  0x1d   :  { %275 = vst [vmem:[#allocation3 + $0x10] sm:$0x3] %v3783_v0  ;;  %276 = vst [vmem:[#allocation3 + $0x18] sm:$0xff] %v3783_v0  ;;  %3134 = vmatprep.subr.mxu1 %v3783_v0  ;;  %3146 = vmatprep.mubr.msk.f32.mxu1 %vm3784_vm0, %v3783_v0  ;;  %v164_v4 = vld [vmem:[%s4713_s7 + $0x28] sm:$0xff]  ;;  %v73_v6 = vld [vmem:[%s4711_s5] sm:$0xff]  ;;  %vm268_vm3 = vcmask 517120  }
  0x1e   :  { %277 = vst [vmem:[#allocation3 + $0x20] sm:$0xff] %v3783_v0  ;;  %278 = vst [vmem:[#allocation3 + $0x28] sm:$0x3] %v3783_v0  ;;  %3124 = vmatpush3.msra.mxu0 %v76_v1  ;;  %3135 = vmatpush3.msra.mxu1 %v164_v4  ;;  %v162_v7 = vld [vmem:[%s4713_s7 + $0x18] sm:$0xff]  ;;  %v72_v8 = vld [vmem:[%s4707_s1] sm:$0x3] }
  0x1f   :  { %3125 = vmatprep.subr.mxu0 %v3783_v0  ;;  %3136 = vmatprep.subr.mxu1 %v3783_v0  ;;  %v311_v9 = vld [vmem:[#allocation4 + $0x78] sm:$0xff]  ;;  %v310_v10 = vld [vmem:[#allocation4 + $0x70] sm:$0xff]  ;;  %v309_v12 = vld [vmem:[#allocation4 + $0x68] sm:$0xff]  ;;  %266 = vst.msk [vmem:[#allocation2] sm:$0xff] %vm265_vm2, %v3783_v0  ;;  %vm172_vm4 = vcmask 392192   ;;  %s3785_s1 = smov 104  }
  0x20   :  { %3126 = vmatpush3.msra.mxu0 %v75_v2  ;;  %3137 = vmatpush3.msra.mxu1 %v163_v5  ;;  %v161_v11 = vld [vmem:[%s4713_s7 + $0x10] sm:$0xff]  ;;  %v308_v13 = vld [vmem:[#allocation4 + $0x60] sm:$0xff]  ;;  %v307_v14 = vld [vmem:[#allocation4 + $0x58] sm:$0xff]  ;;  %267 = vst.msk [vmem:[#allocation2 + $0x8] sm:$0xff] %vm265_vm2, %v3783_v0  ;;  %s3786_s18 = smov 120   ;;  %s3787_s19 = smov 96  }
  0x21   :  { %3127 = vmatprep.subr.mxu0 %v3783_v0  ;;  %3138 = vmatprep.subr.mxu1 %v3783_v0  ;;  %v306_v15 = vld [vmem:[#allocation4 + $0x50] sm:$0xff]  ;;  %v279_v16 = vld [vmem:[%s4706_s0] sm:$0xff]  ;;  %270 = vst.msk [vmem:[#allocation2 + $0x18] sm:$0xff] %vm265_vm2, %v3783_v0  ;;  %271 = vst.msk [vmem:[#allocation2 + $0x20] sm:$0xff] %vm265_vm2, %v3783_v0  ;;  %s3788_s2 = smov 112   ;;  %vm701_vm5 = vcmask 64512  }
  0x22   :  { %3128 = vmatpush3.msra.mxu0 %v74_v3  ;;  %3139 = vmatpush3.msra.mxu1 %v162_v7  ;;  %283 = vst.msk [vmem:[#allocation2 + $0x1] sm:$0xff] %vm265_vm2, %v279_v16  ;;  %v280_v17 = vld [vmem:[%s4706_s0 + $0x8] sm:$0xff]  ;;  %v304_v20 = vld [vmem:[#allocation4 + $0x40] sm:$0xff]  ;;  %v298_v23 = vld [vmem:[#allocation4 + $0x38] sm:$0xff] }
  0x23   :  { %3129 = vmatprep.subr.mxu0 %v3783_v0  ;;  %3140 = vmatprep.subr.mxu1 %v3783_v0  ;;  %269 = vst.msk [vmem:[#allocation2 + $0x10] sm:$0x3] %vm268_vm3, %v3783_v0  ;;  %272 = vst.msk [vmem:[#allocation2 + $0x28] sm:$0x3] %vm268_vm3, %v3783_v0  ;;  %v305_v18 = vld [vmem:[#allocation4 + $0x48] sm:$0xff]  ;;  %v159_v21 = vld [vmem:[%s4713_s7] sm:$0xff] }
  0x24   :  { %3130 = vmatpush3.msra.mxu0 %v73_v6  ;;  %3141 = vmatpush3.msra.mxu1 %v161_v11  ;;  %284 = vst.msk [vmem:[#allocation2 + $0x9] sm:$0xff] %vm265_vm2, %v280_v17  ;;  %v160_v19 = vld [vmem:[%s4713_s7 + $0x8] sm:$0xff]  ;;  %v518_v24 = vld [vmem:[#allocation4 + $0xb8] sm:$0xff]  ;;  %v517_v26 = vld [vmem:[#allocation4 + $0xb0] sm:$0xff] }
  0x25   :  { %3132 = vmatmul.mubr.msk.f32.vlgmr.msra.gmra.mxu0 %vm84_vm1, %v72_v8  ;;  %3149 = vmatprep.subr.mxu0 %v311_v9  ;;  %v281_v27 = vld [vmem:[%s4706_s0 + $0x10] sm:$0xff]  ;;  %v516_v28 = vld [vmem:[#allocation4 + $0xa8] sm:$0xff]  ;;  %v282_v29 = vld [vmem:[%s4706_s0 + $0x18] sm:$0xff] }
  0x26   :  { %3150 = vmatpush3.msra.mxu0 %v311_v9  ;;  %3142 = vmatprep.subr.mxu1 %v3783_v0  ;;  %285 = vst.msk [vmem:[#allocation2 + $0x19] sm:$0xff] %vm265_vm2, %v281_v27  ;;  %286 = vst.msk [vmem:[#allocation2 + $0x21] sm:$0xff] %vm265_vm2, %v282_v29  ;;  %v515_v30 = vld [vmem:[#allocation4 + $0xa0] sm:$0xff]  ;;  %v514_v31 = vld [vmem:[#allocation4 + $0x98] sm:$0xff] }
  0x27   :  { %3151 = vmatprep.subr.mxu0 %v310_v10  ;;  %3143 = vmatpush3.msra.mxu1 %v160_v19  ;;  %v513_v32 = vld [vmem:[#allocation4 + $0x90] sm:$0xff]  ;;  %v512_v35 = vld [vmem:[#allocation4 + $0x88] sm:$0xff]  ;;  %v511_v36 = vld [vmem:[#allocation4 + $0x80] sm:$0xff] }
  0x28   :  { %3152 = vmatpush3.msra.mxu0 %v310_v10  ;;  %3144 = vmatprep.subr.mxu1 %v3783_v0  ;;  %v2778_v41 = vld [vmem:[%s4712_s6] ss:$0 sm:$0xff]  ;;  %v297_v47 = vld [vmem:[#allocation4 + $0x30] sm:$0xff]  ;;  %v296_v48 = vld [vmem:[#allocation4 + $0x28] sm:$0xff] }
  0x29   :  { %3153 = vmatprep.subr.mxu0 %v309_v12  ;;  %3145 = vmatpush3.msra.mxu1 %v159_v21  ;;  %v299_v22 = vld [vmem:[#allocation2 + $0x1] sm:$0xff]  ;;  %v294_v50 = vld [vmem:[#allocation4 + $0x18] sm:$0xff]  ;;  %v293_v51 = vld [vmem:[#allocation4 + $0x10] sm:$0xff] }
  0x2a   :  { %3154 = vmatpush3.msra.mxu0 %v309_v12  ;;  %3165 = vmatprep.mubr.msk.f32.mxu0 %vm265_vm2, %v299_v22  ;;  %v287_v46 = vld [vmem:[#allocation2] sm:$0xff]  ;;  %v292_v52 = vld [vmem:[#allocation4 + $0x8] sm:$0xff]  ;;  %v3970_v57 = vld [vmem:[%s4717_s11 + $0x78] sm:$0xff] }
  0x2b   :  { %3155 = vmatprep.subr.mxu0 %v308_v13  ;;  %3171 = vmatprep.subr.mxu1 %v298_v23  ;;  %v300_v25 = vld [vmem:[#allocation2 + $0x9] sm:$0xff]  ;;  %v295_v49 = vld [vmem:[#allocation4 + $0x20] sm:$0xff]  ;;  %v4005_v61 = vld [vmem:[%s4717_s11 + $0x58] sm:$0xff] }
  0x2c   :  { %3156 = vmatpush3.msra.mxu0 %v308_v13  ;;  %v506_v37 = vld [vmem:[#allocation2 + $0x2] sm:$0xff]  ;;  %v507_v38 = vld [vmem:[#allocation2 + $0xa] sm:$0xff]  ;;  %v4041_v2 = vld [vmem:[%s4717_s11 + $0x38] sm:$0xff] }
  0x2d   :  { %3157 = vmatprep.subr.mxu0 %v307_v14  ;;  %v301_v33 = vld [vmem:[#allocation2 + $0x19] sm:$0xff]  ;;  %v302_v34 = vld [vmem:[#allocation2 + $0x21] sm:$0xff]  ;;  %v3979_v58 = vld [vmem:[%s4717_s11 + $0x70] sm:$0xff] }
  0x2e   :  { %3158 = vmatpush3.msra.mxu0 %v307_v14  ;;  %v508_v39 = vld [vmem:[#allocation2 + $0x1a] sm:$0xff]  ;;  %v509_v40 = vld [vmem:[#allocation2 + $0x22] sm:$0xff]  ;;  %v4014_v62 = vld [vmem:[%s4717_s11 + $0x50] sm:$0xff] }
  0x2f   :  { %3159 = vmatprep.subr.mxu0 %v306_v15  ;;  %v291_v53 = vld [vmem:[#allocation4] sm:$0xff]  ;;  %v288_v54 = vld [vmem:[#allocation2 + $0x8] sm:$0xff]  ;;  %v289_v55 = vld [vmem:[#allocation2 + $0x18] sm:$0xff] }
  0x30   :  { %3160 = vmatpush3.msra.mxu0 %v306_v15  ;;  %v290_v56 = vld [vmem:[#allocation2 + $0x20] sm:$0xff]  ;;  %v3988_v59 = vld [vmem:[%s4717_s11 + $0x68] sm:$0xff]  ;;  %v4050_v3 = vld [vmem:[%s4717_s11 + $0x30] sm:$0xff] }
  0x31   :  { %3161 = vmatprep.subr.mxu0 %v305_v18  ;;  %v3996_v60 = vld [vmem:[%s4717_s11 + $0x60] sm:$0xff]  ;;  %v4023_v63 = vld [vmem:[%s4717_s11 + $0x48] sm:$0xff]  ;;  %v4077_v6 = vld [vmem:[%s4717_s11 + $0x18] sm:$0xff] }
  0x32   :  { %3162 = vmatpush3.msra.mxu0 %v305_v18  ;;  %v4032_v1 = vld [vmem:[%s4717_s11 + $0x40] sm:$0xff]  ;;  %v4059_v4 = vld [vmem:[%s4717_s11 + $0x28] sm:$0xff]  ;;  %v4086_v7 = vld [vmem:[%s4717_s11 + $0x10] sm:$0xff] }
  0x33   :  { %3163 = vmatprep.subr.mxu0 %v304_v20  ;;  %v4068_v5 = vld [vmem:[%s4717_s11 + $0x20] sm:$0xff]  ;;  %v4095_v8 = vld [vmem:[%s4717_s11 + $0x8] sm:$0xff] }
  0x34   :  { %3164 = vmatpush3.msra.mxu0 %v304_v20  ;;  %v4100_v9 = vld [vmem:[%s4717_s11] sm:$0xff] }
  0x35   :  { %3193 = vmatprep.subr.mxu0 %v518_v24  ;;  %3166 = vmatmul.mubr.msk.f32.vlgmr.msra.gmra.mxu0 %vm265_vm2, %v300_v25  ;;  %v2780_v10 = vld [vmem:[%s4714_s8] ss:$0 sm:$0xff]  ;;  %s3789_s8 = smov 88  }
  0x36   :  { %3194 = vmatpush3.msra.mxu0 %v518_v24  ;;  %3168 = vmatprep.mubr.msk.f32.mxu0 %vm265_vm2, %v301_v33 }
  0x37   :  { %3195 = vmatprep.subr.mxu0 %v517_v26 }
  0x38   :  { %3196 = vmatpush3.msra.mxu0 %v517_v26 }
  0x39   :  { %3197 = vmatprep.subr.mxu0 %v516_v28  ;;  %3169 = vmatmul.mubr.msk.f32.gmra.mxu0 %vm265_vm2, %v302_v34 }
  0x3a   :  { %3198 = vmatpush3.msra.mxu0 %v516_v28  ;;  %3209 = vmatprep.mubr.msk.f32.mxu0 %vm265_vm2, %v506_v37 }
  0x3b   :  { %3199 = vmatprep.subr.mxu0 %v515_v30 }
  0x3c   :  { %3200 = vmatpush3.msra.mxu0 %v515_v30 }
  0x3d   :  { %3201 = vmatprep.subr.mxu0 %v514_v31 }
  0x3e   :  { %3202 = vmatpush3.msra.mxu0 %v514_v31 }
  0x3f   :  { %3203 = vmatprep.subr.mxu0 %v513_v32 }
  0x40   :  { %3204 = vmatpush3.msra.mxu0 %v513_v32 }
  0x41   :  { %3205 = vmatprep.subr.mxu0 %v512_v35 }
  0x42   :  { %3206 = vmatpush3.msra.mxu0 %v512_v35 }
  0x43   :  { %3207 = vmatprep.subr.mxu0 %v511_v36 }
  0x44   :  { %3208 = vmatpush3.msra.mxu0 %v511_v36 }
  0x45   :  { %3210 = vmatmul.mubr.msk.f32.vlgmr.msra.gmra.mxu0 %vm265_vm2, %v507_v38  ;;  %3255 = vmatprep.subr.mxu0 %v3783_v0 }
  0x46   :  { %3212 = vmatprep.mubr.msk.f32.mxu0 %vm265_vm2, %v508_v39  ;;  %3256 = vmatpush3.msra.mxu0 %v3970_v57 }
  0x47   :  { %3257 = vmatprep.subr.mxu0 %v3783_v0 }
  0x48   :  { %3258 = vmatpush3.msra.mxu0 %v3979_v58 }
  0x49   :  { %3213 = vmatmul.mubr.msk.f32.gmra.mxu0 %vm265_vm2, %v509_v40  ;;  %3259 = vmatprep.subr.mxu0 %v3783_v0 }
  0x4a   :  { %3287 = vmatprep.mubr.msk.f32.mxu0 %vm3784_vm0, %v3783_v0  ;;  %3260 = vmatpush3.msra.mxu0 %v3988_v59 }
  0x4b   :  { %3261 = vmatprep.subr.mxu0 %v3783_v0 }
  0x4c   :  { %3262 = vmatpush3.msra.mxu0 %v3996_v60 }
  0x4d   :  { %3263 = vmatprep.subr.mxu0 %v3783_v0 }
  0x4e   :  { %3264 = vmatpush3.msra.mxu0 %v4005_v61 }
  0x4f   :  { %3265 = vmatprep.subr.mxu0 %v3783_v0 }
  0x50   :  { %3266 = vmatpush3.msra.mxu0 %v4014_v62 }
  0x51   :  { %3267 = vmatprep.subr.mxu0 %v3783_v0 }
  0x52   :  { %3268 = vmatpush3.msra.mxu0 %v4023_v63 }
  0x53   :  { %3269 = vmatprep.subr.mxu0 %v3783_v0 }
  0x54   :  { %3270 = vmatpush3.msra.mxu0 %v4032_v1 }
  0x55   :  { %3271 = vmatprep.subr.mxu0 %v3783_v0 }
  0x56   :  { %3272 = vmatpush3.msra.mxu0 %v4041_v2 }
  0x57   :  { %3273 = vmatprep.subr.mxu0 %v3783_v0 }
  0x58   :  { %3274 = vmatpush3.msra.mxu0 %v4050_v3 }
  0x59   :  { %3275 = vmatprep.subr.mxu0 %v3783_v0 }
  0x5a   :  { %3276 = vmatpush3.msra.mxu0 %v4059_v4 }
  0x5b   :  { %3277 = vmatprep.subr.mxu0 %v3783_v0 }
  0x5c   :  { %3278 = vmatpush3.msra.mxu0 %v4068_v5 }
  0x5d   :  { %3279 = vmatprep.subr.mxu0 %v3783_v0 }
  0x5e   :  { %3280 = vmatpush3.msra.mxu0 %v4077_v6 }
  0x5f   :  { %3281 = vmatprep.subr.mxu0 %v3783_v0 }
  0x60   :  { %3282 = vmatpush3.msra.mxu0 %v4086_v7 }
  0x61   :  { %3283 = vmatprep.subr.mxu0 %v3783_v0 }
  0x62   :  { %3284 = vmatpush3.msra.mxu0 %v4095_v8 }
  0x63   :  { %3285 = vmatprep.subr.mxu0 %v3783_v0 }
  0x64   :  { %3286 = vmatpush3.msra.mxu0 %v4100_v9 }
  0xe5   :  { %v154_v42 = vpop.f32.mrf.mxu0 }
  0xe6   :  { %v155_v43 = vadd.f32 %v2778_v41, %v154_v42 }
  0xe7   :  { %v3133_v44 = vpop.f32.mrf.mxu0 }
  0xe8   :  { %v158_v45 = vmax.f32 %v155_v43, 0.0  ;;  %v4135_v43 = vld [vmem:[%s4718_s12] sm:$0xff] }
  0xea   :  { %3147 = vmatmul.mubr.msk.f32.vlgmr.msra.gmra.mxu1 %vm172_vm4, %v158_v45 }
  0xeb   :  { %3172 = vmatpush3.msra.mxu1 %v298_v23  ;;  %3187 = vmatprep.mubr.msk.f32.mxu1 %vm265_vm2, %v287_v46 }
  0xec   :  { %3173 = vmatprep.subr.mxu1 %v297_v47 }
  0xed   :  { %3174 = vmatpush3.msra.mxu1 %v297_v47  ;;  %v775_v47 = vlaneseq }
  0xee   :  { %3175 = vmatprep.subr.mxu1 %v296_v48 }
  0xef   :  { %3176 = vmatpush3.msra.mxu1 %v296_v48  ;;  %v4146_v48 = vshrl.u32 %v775_v47, 7 }
  0xf0   :  { %3177 = vmatprep.subr.mxu1 %v295_v49 }
  0xf1   :  { %3178 = vmatpush3.msra.mxu1 %v295_v49  ;;  %v4149_v49 = vsub.s32 0, %v4146_v48 }
  0xf2   :  { %3179 = vmatprep.subr.mxu1 %v294_v50 }
  0xf3   :  { %3180 = vmatpush3.msra.mxu1 %v294_v50 }
  0xf4   :  { %3181 = vmatprep.subr.mxu1 %v293_v51 }
  0xf5   :  { %3182 = vmatpush3.msra.mxu1 %v293_v51  ;;  %v3167_v11 = vpop.f32.mrf.mxu0 }
  0xf6   :  { %3183 = vmatprep.subr.mxu1 %v292_v52 }
  0xf7   :  { %3184 = vmatpush3.msra.mxu1 %v292_v52  ;;  %v390_v15 = vpop.f32.mrf.mxu0 }
  0xf8   :  { %3185 = vmatprep.subr.mxu1 %v291_v53 }
  0xf9   :  { %3186 = vmatpush3.msra.mxu1 %v291_v53  ;;  %v3170_v16 = vpop.f32.mrf.mxu0 }
  0xfa   :  { %3188 = vmatmul.mubr.msk.f32.vlgmr.msra.gmra.mxu1 %vm265_vm2, %v288_v54  ;;  %3215 = vmatprep.subr.mxu1 %v3783_v0 }
  0xfb   :  { %3190 = vmatprep.mubr.msk.f32.mxu1 %vm265_vm2, %v289_v55  ;;  %3216 = vmatpush3.msra.mxu1 %v3970_v57  ;;  %v400_v17 = vpop.f32.mrf.mxu0 }
  0xfc   :  { %3217 = vmatprep.subr.mxu1 %v3783_v0 }
  0xfd   :  { %3218 = vmatpush3.msra.mxu1 %v3979_v58 }
  0xfe   :  { %3191 = vmatmul.mubr.msk.f32.gmra.mxu1 %vm265_vm2, %v290_v56  ;;  %3219 = vmatprep.subr.mxu1 %v3783_v0 }
  0xff   :  { %3247 = vmatprep.mubr.msk.f32.mxu1 %vm3784_vm0, %v3783_v0  ;;  %3220 = vmatpush3.msra.mxu1 %v3988_v59 }
 0x100   :  { %3221 = vmatprep.subr.mxu1 %v3783_v0 }
 0x101   :  { %3222 = vmatpush3.msra.mxu1 %v3996_v60 }
 0x102   :  { %3223 = vmatprep.subr.mxu1 %v3783_v0 }
 0x103   :  { %3224 = vmatpush3.msra.mxu1 %v4005_v61 }
 0x104   :  { %3225 = vmatprep.subr.mxu1 %v3783_v0 }
 0x105   :  { %3226 = vmatpush3.msra.mxu1 %v4014_v62  ;;  %v3211_v18 = vpop.f32.mrf.mxu0 }
 0x106   :  { %3227 = vmatprep.subr.mxu1 %v3783_v0 }
 0x107   :  { %3228 = vmatpush3.msra.mxu1 %v4023_v63  ;;  %v597_v20 = vpop.f32.mrf.mxu0 }
 0x108   :  { %3229 = vmatprep.subr.mxu1 %v3783_v0 }
 0x109   :  { %3230 = vmatpush3.msra.mxu1 %v4032_v1  ;;  %v3214_v25 = vpop.f32.mrf.mxu0 }
 0x10a   :  { %3231 = vmatprep.subr.mxu1 %v3783_v0 }
 0x10b   :  { %3232 = vmatpush3.msra.mxu1 %v4041_v2  ;;  %v607_v31 = vpop.f32.mrf.mxu0 }
 0x10c   :  { %3233 = vmatprep.subr.mxu1 %v3783_v0 }
 0x10d   :  { %3234 = vmatpush3.msra.mxu1 %v4050_v3 }
 0x10e   :  { %3235 = vmatprep.subr.mxu1 %v3783_v0 }
 0x10f   :  { %3236 = vmatpush3.msra.mxu1 %v4059_v4 }
 0x110   :  { %3237 = vmatprep.subr.mxu1 %v3783_v0 }
 0x111   :  { %3238 = vmatpush3.msra.mxu1 %v4068_v5 }
 0x112   :  { %3239 = vmatprep.subr.mxu1 %v3783_v0 }
 0x113   :  { %3240 = vmatpush3.msra.mxu1 %v4077_v6 }
 0x114   :  { %3241 = vmatprep.subr.mxu1 %v3783_v0 }
 0x115   :  { %3242 = vmatpush3.msra.mxu1 %v4086_v7 }
 0x116   :  { %3243 = vmatprep.subr.mxu1 %v3783_v0 }
 0x117   :  { %3244 = vmatpush3.msra.mxu1 %v4095_v8 }
 0x118   :  { %3245 = vmatprep.subr.mxu1 %v3783_v0 }
 0x119   :  { %3246 = vmatpush3.msra.mxu1 %v4100_v9 }
 0x11a   :  { %3250 = vmatprep.subr.mxu1 %v3783_v0 }
 0x1aa   :  { %v242_v12 = vpop.f32.mrf.mxu1 }
 0x1ab   :  { %v4113_v13 = vadd.f32 %v2780_v10, %v242_v12 }
 0x1ac   :  { %v3148_v14 = vpop.f32.mrf.mxu1 }
 0x1ad   :  { %1702 = vrot.lane.b32.xlu1 %v4113_v13, %s3785_s1  ;;  %879 = vrot.lane.b32.xlu0 %v4113_v13, %s3786_s18 }
 0x1b1   :  { %2517 = vrot.lane.b32.xlu1 %v4113_v13, %s3787_s19  ;;  %1694 = vrot.lane.b32.xlu0 %v4113_v13, %s3788_s2 }
 0x1b5   :  { %2525 = vrot.lane.b32.xlu0 %v4113_v13, %s3789_s8 }
 0x1ba   :  { %v3189_v19 = vpop.f32.mrf.mxu1 }
 0x1bb   :  { %v493_v22 = vadd.f32 %v3189_v19, %v3167_v11 }
 0x1bc   :  { %v487_v21 = vpop.f32.mrf.mxu1 }
 0x1bd   :  { %v488_v23 = vadd.f32 %v487_v21, %v390_v15  ;;  %v4122_v28 = vadd.f32 %v3211_v18, %v493_v22 }
 0x1be   :  { %v3192_v24 = vpop.f32.mrf.mxu1 }
 0x1bf   :  { %v4120_v26 = vadd.f32 %v597_v20, %v488_v23  ;;  %v503_v29 = vadd.f32 %v3192_v24, %v3170_v16  ;;  %v1141_v24 = vld [vmem:[%s4709_s3 + $0x78] sm:$0xff] }
 0x1c0   :  { %v497_v27 = vpop.f32.mrf.mxu1  ;;  %3338 = vmatprep.subr.mxu0 %v1141_v24 }
 0x1c1   :  { %v498_v30 = vadd.f32 %v497_v27, %v400_v17  ;;  %v620_v32 = vadd.f32 %v4122_v28, %v4120_v26  ;;  %v4128_v34 = vadd.f32 %v3214_v25, %v503_v29  ;;  %v1140_v25 = vld [vmem:[%s4709_s3 + $0x70] sm:$0xff]  ;;  %v1139_v27 = vld [vmem:[%s4709_s3 + $0x68] sm:$0xff]  ;;  %v1138_v29 = vld [vmem:[%s4709_s3 + $0x60] sm:$0xff] }
 0x1c3   :  { %v4126_v33 = vadd.f32 %v607_v31, %v498_v30 }
 0x1c5   :  { %v621_v35 = vadd.f32 %v620_v32, %v4126_v33 }
 0x1c7   :  { %v622_v36 = vadd.f32 %v621_v35, %v4128_v34 }
 0x1c9   :  { %v623_v37 = vrot.slane %v622_v36, 4 }
 0x1cb   :  { %v624_v38 = vadd.f32 %v623_v37, %v622_v36  ;;  %v4171_v36 = vld [vmem:[%s4715_s9] sm:$0x7] }
 0x1cc   :  { %v872_v37 = vrot.slane %v4171_v36, %v4149_v49 }
 0x1cd   :  { %v625_v39 = vrot.slane %v624_v38, 2 }
 0x1cf   :  { %v626_v40 = vadd.f32 %v625_v39, %v624_v38  ;;  %v4178_v38 = vld [vmem:[%s4716_s10] sm:$0x7] }
 0x1d1   :  { %v627_v41 = vrot.slane %v626_v40, 1 }
 0x1d3   :  { %v628_v42 = vadd.f32 %v627_v41, %v626_v40  ;;  %v877_v40 = vrot.slane %v4178_v38, %v4149_v49  ;;  %v873_v41 = vadd.f32 %v872_v37, %v4113_v13  ;;  %v1127_v37 = vld [vmem:[%s4709_s3 + $0x8] sm:$0xff] }
 0x1d5   :  { %3248 = vmatmul.mubr.f32.vlgmr.msra.gmra.mxu1 %v628_v42 }
 0x1d6   :  { %3251 = vmatpush3.msra.mxu1 %v4135_v43  ;;  %3252 = vmatprep.mubr.msk.f32.mxu1 %vm3784_vm0, %v3783_v0 }
 0x1d7   :  { %3290 = vmatprep.subr.mxu1 %v3783_v0 }
 0x295   :  { %v695_v44 = vpop.f32.mrf.mxu1 }
 0x296   :  { %v700_v45 = vmul.f32 0.001953125, %v695_v44  ;;  %v880_v44 = vpop.permute.xlu0 %879 }
 0x297   :  { %v3249_v46 = vpop.f32.mrf.mxu1 }
 0x298   :  { %3253 = vmatmul.mubr.msk.f32.vlgmr.msra.gmra.mxu1 %vm701_vm5, %v700_v45  ;;  %v891_v46 = vrot.slane %v700_v45, %v4149_v49  ;;  %v2811_v45 = vld [vmem:[%s4709_s3 + $0xf0] sm:$0xff] }
 0x299   :  { %3291 = vmatpush3.msra.mxu1 %v4135_v43  ;;  %3292 = vmatprep.mubr.msk.f32.mxu1 %vm3784_vm0, %v3783_v0 }
 0x29a   :  { %3295 = vmatprep.subr.mxu1 %v3783_v0 }
 0x358   :  { %v771_v50 = vpop.f32.mrf.mxu1 }
 0x359   :  { %v778_v51 = vrot.slane %v771_v50, %v4149_v49  ;;  %v2812_v50 = vld [vmem:[%s4709_s3 + $0xf8] sm:$0xff] }
 0x35a   :  { %v3254_v52 = vpop.f32.mrf.mxu1 }
 0x35b   :  { %v779_v53 = vsub.f32 %v4120_v26, %v778_v51  ;;  %v780_v54 = vsub.f32 %v4122_v28, %v778_v51  ;;  %v781_v55 = vsub.f32 %v4126_v33, %v778_v51  ;;  %v782_v56 = vsub.f32 %v4128_v34, %v778_v51 }
 0x35c   :  { %v882_v51 = vadd.f32 %v880_v44, %v877_v40  ;;  %v3790_v40 = vmov 1966171168  }
 0x35d   :  { %v783_v10 = vmul.f32 %v779_v53, %v779_v53  ;;  %v784_v11 = vmul.f32 %v780_v54, %v780_v54  ;;  %v785_v12 = vmul.f32 %v781_v55, %v781_v55  ;;  %v786_v15 = vmul.f32 %v782_v56, %v782_v56  ;;  %v2810_v53 = vld [vmem:[%s4709_s3 + $0xe8] sm:$0xff]  ;;  %v2809_v54 = vld [vmem:[%s4709_s3 + $0xe0] sm:$0xff]  ;;  %v2808_v55 = vld [vmem:[%s4709_s3 + $0xd8] sm:$0xff] }
 0x35e   :  { %v2807_v56 = vld [vmem:[%s4709_s3 + $0xd0] sm:$0xff] }
 0x35f   :  { %v787_v14 = vadd.f32 %v784_v11, %v783_v10  ;;  %v2806_v10 = vld [vmem:[%s4709_s3 + $0xc8] sm:$0xff]  ;;  %v2805_v11 = vld [vmem:[%s4709_s3 + $0xc0] sm:$0xff] }
 0x361   :  { %v788_v16 = vadd.f32 %v787_v14, %v785_v12  ;;  %v1137_v12 = vld [vmem:[%s4709_s3 + $0x58] sm:$0xff] }
 0x362   :  { %v2804_v14 = vld [vmem:[%s4709_s3 + $0xb8] sm:$0xff] }
 0x363   :  { %v789_v17 = vadd.f32 %v788_v16, %v786_v15  ;;  %v1136_v15 = vld [vmem:[%s4709_s3 + $0x50] sm:$0xff] }
 0x364   :  { %v2803_v16 = vld [vmem:[%s4709_s3 + $0xb0] sm:$0xff] }
 0x365   :  { %v790_v18 = vrot.slane %v789_v17, 4 }
 0x367   :  { %v791_v19 = vadd.f32 %v790_v18, %v789_v17  ;;  %v2802_v17 = vld [vmem:[%s4709_s3 + $0xa8] sm:$0xff] }
 0x368   :  { %v1135_v18 = vld [vmem:[%s4709_s3 + $0x48] sm:$0xff] }
 0x369   :  { %v792_v20 = vrot.slane %v791_v19, 2 }
 0x36b   :  { %v793_v21 = vadd.f32 %v792_v20, %v791_v19  ;;  %v2801_v19 = vld [vmem:[%s4709_s3 + $0xa0] sm:$0xff] }
 0x36c   :  { %v1134_v20 = vld [vmem:[%s4709_s3 + $0x40] sm:$0xff] }
 0x36d   :  { %v794_v22 = vrot.slane %v793_v21, 1 }
 0x36f   :  { %v795_v23 = vadd.f32 %v794_v22, %v793_v21  ;;  %v2800_v21 = vld [vmem:[%s4709_s3 + $0x98] sm:$0xff] }
 0x370   :  { %v1133_v22 = vld [vmem:[%s4709_s3 + $0x38] sm:$0xff] }
 0x371   :  { %3288 = vmatmul.mubr.f32.vlgmr.msra.gmra.mxu0 %v795_v23  ;;  %v2799_v23 = vld [vmem:[%s4709_s3 + $0x90] sm:$0xff] }
 0x372   :  { %3339 = vmatpush3.msra.mxu0 %v1141_v24  ;;  %v1132_v24 = vld [vmem:[%s4709_s3 + $0x30] sm:$0xff] }
 0x373   :  { %3340 = vmatprep.subr.mxu0 %v1140_v25 }
 0x374   :  { %3341 = vmatpush3.msra.mxu0 %v1140_v25  ;;  %v2798_v25 = vld [vmem:[%s4709_s3 + $0x88] sm:$0xff] }
 0x375   :  { %3342 = vmatprep.subr.mxu0 %v1139_v27 }
 0x376   :  { %3343 = vmatpush3.msra.mxu0 %v1139_v27  ;;  %v1131_v27 = vld [vmem:[%s4709_s3 + $0x28] sm:$0xff] }
 0x377   :  { %3344 = vmatprep.subr.mxu0 %v1138_v29 }
 0x378   :  { %3345 = vmatpush3.msra.mxu0 %v1138_v29  ;;  %v2797_v29 = vld [vmem:[%s4709_s3 + $0x80] sm:$0xff] }
 0x379   :  { %3346 = vmatprep.subr.mxu0 %v1137_v12 }
 0x37a   :  { %3347 = vmatpush3.msra.mxu0 %v1137_v12 }
 0x37b   :  { %3348 = vmatprep.subr.mxu0 %v1136_v15 }
 0x37c   :  { %3349 = vmatpush3.msra.mxu0 %v1136_v15 }
 0x37d   :  { %3350 = vmatprep.subr.mxu0 %v1135_v18 }
 0x37e   :  { %3351 = vmatpush3.msra.mxu0 %v1135_v18 }
 0x37f   :  { %3352 = vmatprep.subr.mxu0 %v1134_v20 }
 0x380   :  { %3353 = vmatpush3.msra.mxu0 %v1134_v20 }
 0x381   :  { %3354 = vmatprep.subr.mxu0 %v1133_v22 }
 0x382   :  { %3355 = vmatpush3.msra.mxu0 %v1133_v22 }
 0x383   :  { %3356 = vmatprep.subr.mxu0 %v1132_v24 }
 0x384   :  { %3357 = vmatpush3.msra.mxu0 %v1132_v24 }
 0x385   :  { %3358 = vmatprep.subr.mxu0 %v1131_v27 }
 0x386   :  { %3359 = vmatpush3.msra.mxu0 %v1131_v27 }
 0x431   :  { %v862_v30 = vpop.f32.mrf.mxu0 }
 0x432   :  { %v866_v31 = vmul.f32 0.001953125, %v862_v30  ;;  %v1130_v30 = vld [vmem:[%s4709_s3 + $0x20] sm:$0xff] }
 0x433   :  { %v3289_v32 = vpop.f32.mrf.mxu0  ;;  %3360 = vmatprep.subr.mxu0 %v1130_v30 }
 0x434   :  { %v867_v35 = vadd.f32 1e-05, %v866_v31  ;;  %v2828_v31 = vld [vmem:[%s4709_s3 + $0x178] sm:$0xff]  ;;  %3361 = vmatpush3.msra.mxu0 %v1130_v30 }
 0x435   :  { %v1129_v32 = vld [vmem:[%s4709_s3 + $0x18] sm:$0xff] }
 0x436   :  { %3710 = vrsqrt.f32 %v867_v35  ;;  %3362 = vmatprep.subr.mxu0 %v1129_v32  ;;  %v1128_v35 = vld [vmem:[%s4709_s3 + $0x10] sm:$0xff] }
 0x437   :  { %3363 = vmatpush3.msra.mxu0 %v1129_v32 }
 0x438   :  { %3364 = vmatprep.subr.mxu0 %v1128_v35 }
 0x439   :  { %3365 = vmatpush3.msra.mxu0 %v1128_v35 }
 0x43a   :  { %3366 = vmatprep.subr.mxu0 %v1127_v37 }
 0x43b   :  { %3367 = vmatpush3.msra.mxu0 %v1127_v37  ;;  %v2823_v37 = vld [vmem:[%s4709_s3 + $0x150] sm:$0xff] }
 0x443   :  { %v3711_v39 = vpop.eup %3710 }
 0x444   :  { %v886_v42 = vrot.slane %v3711_v39, %v4149_v49  ;;  %v1126_v39 = vld [vmem:[%s4709_s3] sm:$0xff] }
 0x445   :  { %3368 = vmatprep.subr.mxu0 %v1126_v39 }
 0x446   :  { %v887_v47 = vmul.f32 %v886_v42, %v873_v41  ;;  %3369 = vmatpush3.msra.mxu0 %v1126_v39  ;;  %v1042_v41 = vunpack.c.l.s4 %v3790_v40  ;;  %v2822_v39 = vld [vmem:[%s4709_s3 + $0x148] sm:$0xff] }
 0x447   :  { %3414 = vmatprep.subr.mxu0 %v3783_v0 }
 0x448   :  { %3293 = vmatmul.mubr.msk.f32.vlgmr.msra.gmra.mxu1 %vm701_vm5, %v887_v47  ;;  %v892_v52 = vmul.f32 %v891_v46, %v887_v47  ;;  %v1043_v42 = vunpack.c.0.s8 %v1042_v41  ;;  %v2821_v41 = vld [vmem:[%s4709_s3 + $0x140] sm:$0xff] }
 0x449   :  { %3296 = vmatpush3.msra.mxu1 %v4135_v43  ;;  %3297 = vmatprep.mubr.msk.f32.mxu1 %vm3784_vm0, %v3783_v0 }
 0x44a   :  { %v893_v13 = vsub.f32 %v882_v51, %v892_v52  ;;  %3300 = vmatprep.subr.mxu1 %v2812_v50  ;;  %v4279_v44 = vsub.s32 %v1043_v42, %v4146_v48  ;;  %v2820_v42 = vld [vmem:[%s4709_s3 + $0x138] sm:$0xff] }
 0x44c   :  { %3298 = vmatmul.mubr.msk.f32.vlgmr.msra.gmra.mxu1 %vm701_vm5, %v893_v13 }
 0x44d   :  { %3301 = vmatpush3.msra.mxu1 %v2812_v50 }
 0x44e   :  { %3302 = vmatprep.subr.mxu1 %v2811_v45 }
 0x44f   :  { %3303 = vmatpush3.msra.mxu1 %v2811_v45 }
 0x450   :  { %3304 = vmatprep.subr.mxu1 %v2810_v53 }
 0x451   :  { %3305 = vmatpush3.msra.mxu1 %v2810_v53 }
 0x452   :  { %3306 = vmatprep.subr.mxu1 %v2809_v54 }
 0x453   :  { %3307 = vmatpush3.msra.mxu1 %v2809_v54 }
 0x454   :  { %3308 = vmatprep.subr.mxu1 %v2808_v55 }
 0x455   :  { %3309 = vmatpush3.msra.mxu1 %v2808_v55 }
 0x456   :  { %3310 = vmatprep.subr.mxu1 %v2807_v56 }
 0x457   :  { %3311 = vmatpush3.msra.mxu1 %v2807_v56 }
 0x458   :  { %3312 = vmatprep.subr.mxu1 %v2806_v10 }
 0x459   :  { %3313 = vmatpush3.msra.mxu1 %v2806_v10 }
 0x45a   :  { %3314 = vmatprep.subr.mxu1 %v2805_v11 }
 0x45b   :  { %3315 = vmatpush3.msra.mxu1 %v2805_v11 }
 0x45c   :  { %3316 = vmatprep.subr.mxu1 %v2804_v14 }
 0x45d   :  { %3317 = vmatpush3.msra.mxu1 %v2804_v14 }
 0x45e   :  { %3318 = vmatprep.subr.mxu1 %v2803_v16 }
 0x45f   :  { %3319 = vmatpush3.msra.mxu1 %v2803_v16 }
 0x460   :  { %3320 = vmatprep.subr.mxu1 %v2802_v17 }
 0x461   :  { %3321 = vmatpush3.msra.mxu1 %v2802_v17 }
 0x462   :  { %3322 = vmatprep.subr.mxu1 %v2801_v19 }
 0x463   :  { %3323 = vmatpush3.msra.mxu1 %v2801_v19 }
 0x464   :  { %3324 = vmatprep.subr.mxu1 %v2800_v21 }
 0x465   :  { %3325 = vmatpush3.msra.mxu1 %v2800_v21 }
 0x466   :  { %3326 = vmatprep.subr.mxu1 %v2799_v23 }
 0x467   :  { %3327 = vmatpush3.msra.mxu1 %v2799_v23 }
 0x468   :  { %3328 = vmatprep.subr.mxu1 %v2798_v25 }
 0x469   :  { %3329 = vmatpush3.msra.mxu1 %v2798_v25 }
 0x46a   :  { %3330 = vmatprep.subr.mxu1 %v2797_v29 }
 0x46b   :  { %3331 = vmatpush3.msra.mxu1 %v2797_v29  ;;  %v2824_v29 = vld [vmem:[%s4709_s3 + $0x158] sm:$0xff] }
 0x46c   :  { %3376 = vmatprep.subr.mxu1 %v2828_v31 }
 0x508   :  { %v963_v46 = vpop.f32.mrf.mxu1 }
 0x509   :  { %v1047_v47 = vrot.slane %v963_v46, %v4279_v44  ;;  %v2819_v46 = vld [vmem:[%s4709_s3 + $0x130] sm:$0xff] }
 0x50a   :  { %v3294_v50 = vpop.f32.mrf.mxu1 }
 0x50b   :  { %v1048_v51 = vcombine.high %v1047_v47, %v1047_v47  ;;  %v1055_v52 = vrot.slane %v1047_v47, %v4279_v44  ;;  %v2818_v47 = vld [vmem:[%s4709_s3 + $0x128] sm:$0xff]  ;;  %v2817_v50 = vld [vmem:[%s4709_s3 + $0x120] sm:$0xff] }
 0x50c   :  { %v1036_v13 = vpop.f32.mrf.mxu1 }
 0x50d   :  { %v1062_v45 = vrot.slane %v1048_v51, %v4279_v44  ;;  %v1084_v53 = vrot.slane %v1036_v13, %v4279_v44  ;;  %v1066_v54 = vrot.slane %v1055_v52, %v4149_v49  ;;  %v2816_v51 = vld [vmem:[%s4709_s3 + $0x118] sm:$0xff]  ;;  %v2815_v52 = vld [vmem:[%s4709_s3 + $0x110] sm:$0xff]  ;;  %v2814_v13 = vld [vmem:[%s4709_s3 + $0x108] sm:$0xff] }
 0x50e   :  { %v3299_v55 = vpop.f32.mrf.mxu1 }
 0x50f   :  { %v1070_v56 = vrot.slane %v1062_v45, %v4149_v49  ;;  %v1085_v10 = vcombine.high %v1084_v53, %v1084_v53  ;;  %v1092_v11 = vrot.slane %v1084_v53, %v4279_v44  ;;  %v1073_v14 = vmul.f32 %v1066_v54, %v4120_v26  ;;  %v2813_v45 = vld [vmem:[%s4709_s3 + $0x100] sm:$0xff] }
 0x510   :  { %v1074_v15 = vmul.f32 %v1066_v54, %v4122_v28  ;;  %v2827_v28 = vld [vmem:[%s4709_s3 + $0x170] sm:$0xff] }
 0x511   :  { %v1099_v12 = vrot.slane %v1085_v10, %v4279_v44  ;;  %v1103_v16 = vrot.slane %v1092_v11, %v4149_v49  ;;  %v1075_v17 = vmul.f32 %v1070_v56, %v4126_v33  ;;  %v1076_v18 = vmul.f32 %v1070_v56, %v4128_v34  ;;  %v2826_v33 = vld [vmem:[%s4709_s3 + $0x168] sm:$0xff]  ;;  %v2825_v34 = vld [vmem:[%s4709_s3 + $0x160] sm:$0xff] }
 0x513   :  { %v1107_v19 = vrot.slane %v1099_v12, %v4149_v49  ;;  %v1110_v20 = vadd.f32 %v1103_v16, %v1073_v14  ;;  %v1111_v21 = vadd.f32 %v1103_v16, %v1074_v15 }
 0x515   :  { %v1112_v22 = vadd.f32 %v1107_v19, %v1075_v17  ;;  %v1113_v23 = vadd.f32 %v1107_v19, %v1076_v18  ;;  %v4295_v24 = vmax.f32 %v1110_v20, 0.0  ;;  %v4297_v25 = vmax.f32 %v1111_v21, 0.0 }
 0x517   :  { %v4299_v27 = vmax.f32 %v1112_v22, 0.0  ;;  %v4301_v26 = vmax.f32 %v1113_v23, 0.0  ;;  %1118 = vst [vmem:[#allocation3 + $0x1] sm:$0xff] %v4295_v24  ;;  %1119 = vst [vmem:[#allocation3 + $0x9] sm:$0xff] %v4297_v25  ;;  %3332 = vmatprep.mubr.f32.mxu1 %v4295_v24 }
 0x518   :  { %3333 = vmatmul.mubr.f32.vlgmr.msra.gmra.mxu1 %v4297_v25 }
 0x519   :  { %1120 = vst [vmem:[#allocation3 + $0x19] sm:$0xff] %v4299_v27  ;;  %1121 = vst [vmem:[#allocation3 + $0x21] sm:$0xff] %v4301_v26  ;;  %3377 = vmatpush3.msra.mxu1 %v2828_v31  ;;  %3335 = vmatprep.mubr.f32.mxu1 %v4299_v27 }
 0x51a   :  { %3378 = vmatprep.subr.mxu1 %v2827_v28 }
 0x51b   :  { %3379 = vmatpush3.msra.mxu1 %v2827_v28 }
 0x51c   :  { %3380 = vmatprep.subr.mxu1 %v2826_v33  ;;  %3336 = vmatmul.mubr.f32.gmra.mxu1 %v4301_v26 }
 0x51d   :  { %3381 = vmatpush3.msra.mxu1 %v2826_v33 }
 0x51e   :  { %v1122_v30 = vld [vmem:[#allocation3] sm:$0xff]  ;;  %v1123_v31 = vld [vmem:[#allocation3 + $0x8] sm:$0xff]  ;;  %3382 = vmatprep.subr.mxu1 %v2825_v34 }
 0x51f   :  { %v1333_v32 = vld [vmem:[#allocation3 + $0x2] sm:$0xff]  ;;  %3370 = vmatprep.mubr.f32.mxu0 %v1122_v30  ;;  %3383 = vmatpush3.msra.mxu1 %v2825_v34  ;;  %v1334_v53 = vld [vmem:[#allocation3 + $0xa] sm:$0xff] }
 0x520   :  { %v1124_v35 = vld [vmem:[#allocation3 + $0x18] sm:$0xff]  ;;  %3408 = vmatprep.mubr.f32.mxu1 %v1333_v32  ;;  %3371 = vmatmul.mubr.f32.vlgmr.msra.gmra.mxu0 %v1123_v31  ;;  %v1125_v40 = vld [vmem:[#allocation3 + $0x20] sm:$0xff] }
 0x521   :  { %3373 = vmatprep.mubr.f32.mxu0 %v1124_v35  ;;  %3384 = vmatprep.subr.mxu1 %v2824_v29  ;;  %v1335_v54 = vld [vmem:[#allocation3 + $0x1a] sm:$0xff]  ;;  %v1336_v55 = vld [vmem:[#allocation3 + $0x22] sm:$0xff] }
 0x522   :  { %3385 = vmatpush3.msra.mxu1 %v2824_v29  ;;  %3415 = vmatpush3.msra.mxu0 %v3970_v57 }
 0x523   :  { %3386 = vmatprep.subr.mxu1 %v2823_v37  ;;  %3416 = vmatprep.subr.mxu0 %v3783_v0 }
 0x524   :  { %3374 = vmatmul.mubr.f32.gmra.mxu0 %v1125_v40  ;;  %3387 = vmatpush3.msra.mxu1 %v2823_v37 }
 0x525   :  { %3388 = vmatprep.subr.mxu1 %v2822_v39  ;;  %3417 = vmatpush3.msra.mxu0 %v3979_v58 }
 0x526   :  { %3389 = vmatpush3.msra.mxu1 %v2822_v39  ;;  %3418 = vmatprep.subr.mxu0 %v3783_v0 }
 0x527   :  { %3390 = vmatprep.subr.mxu1 %v2821_v41  ;;  %3419 = vmatpush3.msra.mxu0 %v3988_v59 }
 0x528   :  { %3391 = vmatpush3.msra.mxu1 %v2821_v41  ;;  %3420 = vmatprep.subr.mxu0 %v3783_v0 }
 0x529   :  { %3392 = vmatprep.subr.mxu1 %v2820_v42  ;;  %3421 = vmatpush3.msra.mxu0 %v3996_v60 }
 0x52a   :  { %3393 = vmatpush3.msra.mxu1 %v2820_v42  ;;  %3422 = vmatprep.subr.mxu0 %v3783_v0 }
 0x52b   :  { %3394 = vmatprep.subr.mxu1 %v2819_v46  ;;  %3423 = vmatpush3.msra.mxu0 %v4005_v61 }
 0x52c   :  { %3395 = vmatpush3.msra.mxu1 %v2819_v46  ;;  %3424 = vmatprep.subr.mxu0 %v3783_v0 }
 0x52d   :  { %3396 = vmatprep.subr.mxu1 %v2818_v47  ;;  %3425 = vmatpush3.msra.mxu0 %v4014_v62 }
 0x52e   :  { %3397 = vmatpush3.msra.mxu1 %v2818_v47  ;;  %3426 = vmatprep.subr.mxu0 %v3783_v0 }
 0x52f   :  { %3398 = vmatprep.subr.mxu1 %v2817_v50  ;;  %3427 = vmatpush3.msra.mxu0 %v4023_v63 }
 0x530   :  { %3399 = vmatpush3.msra.mxu1 %v2817_v50  ;;  %3428 = vmatprep.subr.mxu0 %v3783_v0 }
 0x531   :  { %3400 = vmatprep.subr.mxu1 %v2816_v51  ;;  %3429 = vmatpush3.msra.mxu0 %v4032_v1 }
 0x532   :  { %3401 = vmatpush3.msra.mxu1 %v2816_v51  ;;  %3430 = vmatprep.subr.mxu0 %v3783_v0 }
 0x533   :  { %3402 = vmatprep.subr.mxu1 %v2815_v52  ;;  %3431 = vmatpush3.msra.mxu0 %v4041_v2 }
 0x534   :  { %3403 = vmatpush3.msra.mxu1 %v2815_v52  ;;  %3432 = vmatprep.subr.mxu0 %v3783_v0 }
 0x535   :  { %3404 = vmatprep.subr.mxu1 %v2814_v13  ;;  %3433 = vmatpush3.msra.mxu0 %v4050_v3 }
 0x536   :  { %3405 = vmatpush3.msra.mxu1 %v2814_v13  ;;  %3434 = vmatprep.subr.mxu0 %v3783_v0 }
 0x537   :  { %3406 = vmatprep.subr.mxu1 %v2813_v45  ;;  %3435 = vmatpush3.msra.mxu0 %v4059_v4 }
 0x538   :  { %3407 = vmatpush3.msra.mxu1 %v2813_v45  ;;  %3436 = vmatprep.subr.mxu0 %v3783_v0 }
 0x539   :  { %3409 = vmatmul.mubr.f32.vlgmr.msra.gmra.mxu1 %v1334_v53  ;;  %3437 = vmatpush3.msra.mxu0 %v4068_v5 }
 0x53a   :  { %3411 = vmatprep.mubr.f32.mxu1 %v1335_v54  ;;  %3438 = vmatprep.subr.mxu0 %v3783_v0 }
 0x53b   :  { %3439 = vmatpush3.msra.mxu0 %v4077_v6  ;;  %3446 = vmatprep.mubr.msk.f32.mxu0 %vm3784_vm0, %v3783_v0 }
 0x53c   :  { %3440 = vmatprep.subr.mxu0 %v3783_v0  ;;  %3449 = vmatprep.subr.mxu1 %v3783_v0 }
 0x53d   :  { %3412 = vmatmul.mubr.f32.gmra.mxu1 %v1336_v55  ;;  %3441 = vmatpush3.msra.mxu0 %v4086_v7  ;;  %v1964_v55 = vld [vmem:[#allocation6 + $0x78] sm:$0xff] }
 0x53e   :  { %3442 = vmatprep.subr.mxu0 %v3783_v0  ;;  %3450 = vmatpush3.msra.mxu1 %v4135_v43 }
 0x53f   :  { %3443 = vmatpush3.msra.mxu0 %v4095_v8  ;;  %3451 = vmatprep.mubr.msk.f32.mxu1 %vm3784_vm0, %v3783_v0 }
 0x540   :  { %3444 = vmatprep.subr.mxu0 %v3783_v0  ;;  %3454 = vmatprep.subr.mxu1 %v3783_v0 }
 0x541   :  { %3445 = vmatpush3.msra.mxu0 %v4100_v9 }
 0x542   :  { %3489 = vmatprep.subr.mxu0 %v3783_v0 }
 0x5d8   :  { %v3334_v56 = vpop.f32.mrf.mxu1 }
 0x5da   :  { %v1229_v11 = vpop.f32.mrf.mxu1 }
 0x5dc   :  { %v3337_v14 = vpop.f32.mrf.mxu1 }
 0x5de   :  { %v1239_v16 = vpop.f32.mrf.mxu1 }
 0x5e0   :  { %v3372_v10 = vpop.f32.mrf.mxu0 }
 0x5e1   :  { %v1320_v21 = vadd.f32 %v3372_v10, %v3334_v56  ;;  %v1963_v56 = vld [vmem:[#allocation6 + $0x70] sm:$0xff]  ;;  %v1962_v10 = vld [vmem:[#allocation6 + $0x68] sm:$0xff] }
 0x5e2   :  { %v1314_v12 = vpop.f32.mrf.mxu0 }
 0x5e3   :  { %v1315_v18 = vadd.f32 %v1314_v12, %v1229_v11  ;;  %v1961_v11 = vld [vmem:[#allocation6 + $0x60] sm:$0xff] }
 0x5e4   :  { %v3375_v15 = vpop.f32.mrf.mxu0 }
 0x5e5   :  { %v1330_v29 = vadd.f32 %v3375_v15, %v3337_v14 }
 0x5e6   :  { %v1324_v19 = vpop.f32.mrf.mxu0 }
 0x5e7   :  { %v1325_v28 = vadd.f32 %v1324_v19, %v1239_v16  ;;  %v1695_v19 = vpop.permute.xlu0 %1694 }
 0x5f9   :  { %v3410_v17 = vpop.f32.mrf.mxu1 }
 0x5fa   :  { %v4397_v33 = vadd.f32 %v3410_v17, %v1320_v21  ;;  %v1692_v17 = vsub.s32 1, %v4146_v48 }
 0x5fb   :  { %v1420_v20 = vpop.f32.mrf.mxu1 }
 0x5fc   :  { %v4395_v22 = vadd.f32 %v1420_v20, %v1315_v18  ;;  %v1693_v18 = vrot.slane %v4171_v36, %v1692_v17  ;;  %v1701_v21 = vrot.slane %v4178_v38, %v1692_v17  ;;  %v1984_v38 = vld [vmem:[#allocation6 + $0xf0] sm:$0xff] }
 0x5fd   :  { %v3413_v23 = vpop.f32.mrf.mxu1 }
 0x5fe   :  { %v1443_v30 = vadd.f32 %v4397_v33, %v4395_v22  ;;  %v4403_v32 = vadd.f32 %v3413_v23, %v1330_v29  ;;  %v1697_v23 = vadd.f32 %v1695_v19, %v1693_v18 }
 0x5ff   :  { %v1430_v34 = vpop.f32.mrf.mxu1 }
 0x600   :  { %v4401_v31 = vadd.f32 %v1430_v34, %v1325_v28  ;;  %v1703_v34 = vpop.permute.xlu1 %1702 }
 0x602   :  { %v1444_v35 = vadd.f32 %v1443_v30, %v4401_v31 }
 0x604   :  { %v1445_v37 = vadd.f32 %v1444_v35, %v4403_v32  ;;  %v1985_v35 = vld [vmem:[#allocation6 + $0xf8] sm:$0xff] }
 0x606   :  { %v1446_v39 = vrot.slane %v1445_v37, 4 }
 0x608   :  { %v1447_v40 = vadd.f32 %v1446_v39, %v1445_v37  ;;  %v1705_v37 = vadd.f32 %v1703_v34, %v1701_v21 }
 0x60a   :  { %v1448_v41 = vrot.slane %v1447_v40, 2 }
 0x60c   :  { %v1449_v42 = vadd.f32 %v1448_v41, %v1447_v40  ;;  %v1983_v40 = vld [vmem:[#allocation6 + $0xe8] sm:$0xff]  ;;  %v1982_v41 = vld [vmem:[#allocation6 + $0xe0] sm:$0xff] }
 0x60e   :  { %v1450_v46 = vrot.slane %v1449_v42, 1 }
 0x610   :  { %v1451_v47 = vadd.f32 %v1450_v46, %v1449_v42  ;;  %v1981_v42 = vld [vmem:[#allocation6 + $0xd8] sm:$0xff]  ;;  %v1979_v46 = vld [vmem:[#allocation6 + $0xc8] sm:$0xff] }
 0x612   :  { %3447 = vmatmul.mubr.f32.vlgmr.msra.gmra.mxu0 %v1451_v47  ;;  %v1978_v47 = vld [vmem:[#allocation6 + $0xc0] sm:$0xff] }
 0x613   :  { %3490 = vmatpush3.msra.mxu0 %v4135_v43  ;;  %3491 = vmatprep.mubr.msk.f32.mxu0 %vm3784_vm0, %v3783_v0 }
 0x614   :  { %3494 = vmatprep.subr.mxu0 %v3783_v0 }
 0x6d2   :  { %v1518_v50 = vpop.f32.mrf.mxu0 }
 0x6d3   :  { %v4411_v51 = vmul.f32 0.001953125, %v1518_v50  ;;  %v1960_v50 = vld [vmem:[#allocation6 + $0x58] sm:$0xff] }
 0x6d4   :  { %v3448_v52 = vpop.f32.mrf.mxu0 }
 0x6d5   :  { %3452 = vmatmul.mubr.msk.f32.vlgmr.msra.gmra.mxu1 %vm701_vm5, %v4411_v51  ;;  %v1714_v29 = vrot.slane %v4411_v51, %v4149_v49  ;;  %v1977_v51 = vld [vmem:[#allocation6 + $0xb8] sm:$0xff]  ;;  %v1959_v52 = vld [vmem:[#allocation6 + $0x50] sm:$0xff] }
 0x6d6   :  { %3455 = vmatpush3.msra.mxu1 %v3970_v57  ;;  %3486 = vmatprep.mubr.msk.f32.mxu1 %vm3784_vm0, %v3783_v0 }
 0x6d7   :  { %3456 = vmatprep.subr.mxu1 %v3783_v0 }
 0x6d8   :  { %3457 = vmatpush3.msra.mxu1 %v3979_v58 }
 0x6d9   :  { %3458 = vmatprep.subr.mxu1 %v3783_v0 }
 0x6da   :  { %3459 = vmatpush3.msra.mxu1 %v3988_v59 }
 0x6db   :  { %3460 = vmatprep.subr.mxu1 %v3783_v0 }
 0x6dc   :  { %3461 = vmatpush3.msra.mxu1 %v3996_v60 }
 0x6dd   :  { %3462 = vmatprep.subr.mxu1 %v3783_v0 }
 0x6de   :  { %3463 = vmatpush3.msra.mxu1 %v4005_v61 }
 0x6df   :  { %3464 = vmatprep.subr.mxu1 %v3783_v0 }
 0x6e0   :  { %3465 = vmatpush3.msra.mxu1 %v4014_v62 }
 0x6e1   :  { %3466 = vmatprep.subr.mxu1 %v3783_v0 }
 0x6e2   :  { %3467 = vmatpush3.msra.mxu1 %v4023_v63 }
 0x6e3   :  { %3468 = vmatprep.subr.mxu1 %v3783_v0 }
 0x6e4   :  { %3469 = vmatpush3.msra.mxu1 %v4032_v1 }
 0x6e5   :  { %3470 = vmatprep.subr.mxu1 %v3783_v0 }
 0x6e6   :  { %3471 = vmatpush3.msra.mxu1 %v4041_v2 }
 0x6e7   :  { %3472 = vmatprep.subr.mxu1 %v3783_v0 }
 0x6e8   :  { %3473 = vmatpush3.msra.mxu1 %v4050_v3 }
 0x6e9   :  { %3474 = vmatprep.subr.mxu1 %v3783_v0 }
 0x6ea   :  { %3475 = vmatpush3.msra.mxu1 %v4059_v4 }
 0x6eb   :  { %3476 = vmatprep.subr.mxu1 %v3783_v0 }
 0x6ec   :  { %3477 = vmatpush3.msra.mxu1 %v4068_v5 }
 0x6ed   :  { %3478 = vmatprep.subr.mxu1 %v3783_v0 }
 0x6ee   :  { %3479 = vmatpush3.msra.mxu1 %v4077_v6 }
 0x6ef   :  { %3480 = vmatprep.subr.mxu1 %v3783_v0 }
 0x6f0   :  { %3481 = vmatpush3.msra.mxu1 %v4086_v7 }
 0x6f1   :  { %3482 = vmatprep.subr.mxu1 %v3783_v0 }
 0x6f2   :  { %3483 = vmatpush3.msra.mxu1 %v4095_v8 }
 0x6f3   :  { %3484 = vmatprep.subr.mxu1 %v3783_v0 }
 0x6f4   :  { %3485 = vmatpush3.msra.mxu1 %v4100_v9 }
 0x6f5   :  { %3537 = vmatprep.subr.mxu1 %v1964_v55 }
 0x795   :  { %v1592_v57 = vpop.f32.mrf.mxu1 }
 0x796   :  { %v1599_v58 = vrot.slane %v1592_v57, %v4149_v49  ;;  %v1976_v57 = vld [vmem:[#allocation6 + $0xb0] sm:$0xff] }
 0x797   :  { %v3453_v59 = vpop.f32.mrf.mxu1 }
 0x798   :  { %v1600_v60 = vsub.f32 %v4395_v22, %v1599_v58  ;;  %v1601_v61 = vsub.f32 %v4397_v33, %v1599_v58  ;;  %v1602_v62 = vsub.f32 %v4401_v31, %v1599_v58  ;;  %v1603_v63 = vsub.f32 %v4403_v32, %v1599_v58  ;;  %v1975_v58 = vld [vmem:[#allocation6 + $0xa8] sm:$0xff] }
 0x799   :  { %v1958_v59 = vld [vmem:[#allocation6 + $0x48] sm:$0xff] }
 0x79a   :  { %v1604_v1 = vmul.f32 %v1600_v60, %v1600_v60  ;;  %v1605_v2 = vmul.f32 %v1601_v61, %v1601_v61  ;;  %v1606_v3 = vmul.f32 %v1602_v62, %v1602_v62  ;;  %v1607_v5 = vmul.f32 %v1603_v63, %v1603_v63  ;;  %v1974_v60 = vld [vmem:[#allocation6 + $0xa0] sm:$0xff]  ;;  %v1973_v62 = vld [vmem:[#allocation6 + $0x98] sm:$0xff] }
 0x79b   :  { %v1957_v61 = vld [vmem:[#allocation6 + $0x40] sm:$0xff]  ;;  %v1956_v63 = vld [vmem:[#allocation6 + $0x38] sm:$0xff] }
 0x79c   :  { %v1608_v4 = vadd.f32 %v1605_v2, %v1604_v1  ;;  %v1972_v1 = vld [vmem:[#allocation6 + $0x90] sm:$0xff] }
 0x79d   :  { %v1955_v2 = vld [vmem:[#allocation6 + $0x30] sm:$0xff] }
 0x79e   :  { %v1609_v6 = vadd.f32 %v1608_v4, %v1606_v3  ;;  %v1971_v3 = vld [vmem:[#allocation6 + $0x88] sm:$0xff] }
 0x79f   :  { %v1954_v4 = vld [vmem:[#allocation6 + $0x28] sm:$0xff] }
 0x7a0   :  { %v1610_v7 = vadd.f32 %v1609_v6, %v1607_v5  ;;  %v1970_v5 = vld [vmem:[#allocation6 + $0x80] sm:$0xff] }
 0x7a1   :  { %v1953_v6 = vld [vmem:[#allocation6 + $0x20] sm:$0xff] }
 0x7a2   :  { %v1611_v8 = vrot.slane %v1610_v7, 4 }
 0x7a4   :  { %v1612_v9 = vadd.f32 %v1611_v8, %v1610_v7  ;;  %v2176_v7 = vld [vmem:[#allocation6 + $0x178] sm:$0xff] }
 0x7a5   :  { %v1952_v8 = vld [vmem:[#allocation6 + $0x18] sm:$0xff] }
 0x7a6   :  { %v1613_v13 = vrot.slane %v1612_v9, 2 }
 0x7a8   :  { %v1614_v45 = vadd.f32 %v1613_v13, %v1612_v9  ;;  %v1951_v9 = vld [vmem:[#allocation6 + $0x10] sm:$0xff]  ;;  %v1950_v13 = vld [vmem:[#allocation6 + $0x8] sm:$0xff] }
 0x7aa   :  { %v1615_v53 = vrot.slane %v1614_v45, 1 }
 0x7ac   :  { %v1616_v54 = vadd.f32 %v1615_v53, %v1614_v45  ;;  %v1949_v45 = vld [vmem:[#allocation6] sm:$0xff] }
 0x7ae   :  { %3487 = vmatmul.mubr.f32.vlgmr.msra.gmra.mxu1 %v1616_v54 }
 0x7af   :  { %3538 = vmatpush3.msra.mxu1 %v1964_v55 }
 0x7b0   :  { %3539 = vmatprep.subr.mxu1 %v1963_v56 }
 0x7b1   :  { %3540 = vmatpush3.msra.mxu1 %v1963_v56 }
 0x7b2   :  { %3541 = vmatprep.subr.mxu1 %v1962_v10 }
 0x7b3   :  { %3542 = vmatpush3.msra.mxu1 %v1962_v10 }
 0x7b4   :  { %3543 = vmatprep.subr.mxu1 %v1961_v11 }
 0x7b5   :  { %3544 = vmatpush3.msra.mxu1 %v1961_v11 }
 0x7b6   :  { %3545 = vmatprep.subr.mxu1 %v1960_v50 }
 0x7b7   :  { %3546 = vmatpush3.msra.mxu1 %v1960_v50 }
 0x7b8   :  { %3547 = vmatprep.subr.mxu1 %v1959_v52 }
 0x7b9   :  { %3548 = vmatpush3.msra.mxu1 %v1959_v52  ;;  %v2170_v52 = vld [vmem:[#allocation6 + $0x148] sm:$0xff] }
 0x7ba   :  { %3549 = vmatprep.subr.mxu1 %v1958_v59 }
 0x7bb   :  { %3550 = vmatpush3.msra.mxu1 %v1958_v59  ;;  %v2169_v59 = vld [vmem:[#allocation6 + $0x140] sm:$0xff] }
 0x7bc   :  { %3551 = vmatprep.subr.mxu1 %v1957_v61 }
 0x7bd   :  { %3552 = vmatpush3.msra.mxu1 %v1957_v61  ;;  %v2168_v61 = vld [vmem:[#allocation6 + $0x138] sm:$0xff] }
 0x7be   :  { %3553 = vmatprep.subr.mxu1 %v1956_v63 }
 0x7bf   :  { %3554 = vmatpush3.msra.mxu1 %v1956_v63  ;;  %v2167_v63 = vld [vmem:[#allocation6 + $0x130] sm:$0xff] }
 0x7c0   :  { %3555 = vmatprep.subr.mxu1 %v1955_v2 }
 0x7c1   :  { %3556 = vmatpush3.msra.mxu1 %v1955_v2  ;;  %v2166_v2 = vld [vmem:[#allocation6 + $0x128] sm:$0xff] }
 0x7c2   :  { %3557 = vmatprep.subr.mxu1 %v1954_v4 }
 0x7c3   :  { %3558 = vmatpush3.msra.mxu1 %v1954_v4  ;;  %v2165_v4 = vld [vmem:[#allocation6 + $0x120] sm:$0xff] }
 0x7c4   :  { %3559 = vmatprep.subr.mxu1 %v1953_v6 }
 0x7c5   :  { %3560 = vmatpush3.msra.mxu1 %v1953_v6  ;;  %v2164_v6 = vld [vmem:[#allocation6 + $0x118] sm:$0xff] }
 0x7c6   :  { %3561 = vmatprep.subr.mxu1 %v1952_v8 }
 0x7c7   :  { %3562 = vmatpush3.msra.mxu1 %v1952_v8  ;;  %v2163_v8 = vld [vmem:[#allocation6 + $0x110] sm:$0xff] }
 0x7c8   :  { %3563 = vmatprep.subr.mxu1 %v1951_v9 }
 0x7c9   :  { %3564 = vmatpush3.msra.mxu1 %v1951_v9  ;;  %v4531_v9 = vld [vmem:[%s4717_s11 + $0x40] sm:$0xff] }
 0x7ca   :  { %3565 = vmatprep.subr.mxu1 %v1950_v13 }
 0x7cb   :  { %3566 = vmatpush3.msra.mxu1 %v1950_v13  ;;  %v2162_v13 = vld [vmem:[#allocation6 + $0x108] sm:$0xff] }
 0x7cc   :  { %3567 = vmatprep.subr.mxu1 %v1949_v45 }
 0x7cd   :  { %3568 = vmatpush3.msra.mxu1 %v1949_v45  ;;  %v4538_v45 = vld [vmem:[%s4717_s11 + $0x38] sm:$0xff] }
 0x7ce   :  { %3613 = vmatprep.subr.mxu1 %v3783_v0 }
 0x86e   :  { %v1683_v12 = vpop.f32.mrf.mxu1 }
 0x86f   :  { %v1687_v14 = vmul.f32 0.001953125, %v1683_v12 }
 0x870   :  { %v3488_v15 = vpop.f32.mrf.mxu1 }
 0x871   :  { %v1688_v16 = vadd.f32 1e-05, %v1687_v14 }
 0x873   :  { %3712 = vrsqrt.f32 %v1688_v16 }
 0x880   :  { %v3713_v20 = vpop.eup %3712 }
 0x881   :  { %v1709_v28 = vrot.slane %v3713_v20, %v4149_v49 }
 0x883   :  { %v1710_v30 = vmul.f32 %v1709_v28, %v1697_v23 }
 0x885   :  { %3492 = vmatmul.mubr.msk.f32.vlgmr.msra.gmra.mxu0 %vm701_vm5, %v1710_v30  ;;  %v1715_v39 = vmul.f32 %v1714_v29, %v1710_v30 }
 0x886   :  { %3495 = vmatpush3.msra.mxu0 %v4135_v43  ;;  %3496 = vmatprep.mubr.msk.f32.mxu0 %vm3784_vm0, %v3783_v0  ;;  %v1980_v43 = vld [vmem:[#allocation6 + $0xd0] sm:$0xff] }
 0x887   :  { %v1716_v36 = vsub.f32 %v1705_v37, %v1715_v39  ;;  %3499 = vmatprep.subr.mxu0 %v1985_v35 }
 0x889   :  { %3497 = vmatmul.mubr.msk.f32.vlgmr.msra.gmra.mxu0 %vm701_vm5, %v1716_v36 }
 0x88a   :  { %3500 = vmatpush3.msra.mxu0 %v1985_v35 }
 0x88b   :  { %3501 = vmatprep.subr.mxu0 %v1984_v38 }
 0x88c   :  { %3502 = vmatpush3.msra.mxu0 %v1984_v38 }
 0x88d   :  { %3503 = vmatprep.subr.mxu0 %v1983_v40 }
 0x88e   :  { %3504 = vmatpush3.msra.mxu0 %v1983_v40 }
 0x88f   :  { %3505 = vmatprep.subr.mxu0 %v1982_v41 }
 0x890   :  { %3506 = vmatpush3.msra.mxu0 %v1982_v41 }
 0x891   :  { %3507 = vmatprep.subr.mxu0 %v1981_v42 }
 0x892   :  { %3508 = vmatpush3.msra.mxu0 %v1981_v42 }
 0x893   :  { %3509 = vmatprep.subr.mxu0 %v1980_v43 }
 0x894   :  { %3510 = vmatpush3.msra.mxu0 %v1980_v43 }
 0x895   :  { %3511 = vmatprep.subr.mxu0 %v1979_v46 }
 0x896   :  { %3512 = vmatpush3.msra.mxu0 %v1979_v46 }
 0x897   :  { %3513 = vmatprep.subr.mxu0 %v1978_v47 }
 0x898   :  { %3514 = vmatpush3.msra.mxu0 %v1978_v47 }
 0x899   :  { %3515 = vmatprep.subr.mxu0 %v1977_v51 }
 0x89a   :  { %3516 = vmatpush3.msra.mxu0 %v1977_v51  ;;  %v2171_v51 = vld [vmem:[#allocation6 + $0x150] sm:$0xff] }
 0x89b   :  { %3517 = vmatprep.subr.mxu0 %v1976_v57 }
 0x89c   :  { %3518 = vmatpush3.msra.mxu0 %v1976_v57  ;;  %v4482_v57 = vld [vmem:[%s4717_s11 + $0x78] sm:$0xff] }
 0x89d   :  { %3519 = vmatprep.subr.mxu0 %v1975_v58 }
 0x89e   :  { %3520 = vmatpush3.msra.mxu0 %v1975_v58 }
 0x89f   :  { %3521 = vmatprep.subr.mxu0 %v1974_v60 }
 0x8a0   :  { %3522 = vmatpush3.msra.mxu0 %v1974_v60  ;;  %v4489_v60 = vld [vmem:[%s4717_s11 + $0x70] sm:$0xff] }
 0x8a1   :  { %3523 = vmatprep.subr.mxu0 %v1973_v62 }
 0x8a2   :  { %3524 = vmatpush3.msra.mxu0 %v1973_v62  ;;  %v4496_v62 = vld [vmem:[%s4717_s11 + $0x68] sm:$0xff] }
 0x8a3   :  { %3525 = vmatprep.subr.mxu0 %v1972_v1 }
 0x8a4   :  { %3526 = vmatpush3.msra.mxu0 %v1972_v1  ;;  %v4503_v1 = vld [vmem:[%s4717_s11 + $0x60] sm:$0xff] }
 0x8a5   :  { %3527 = vmatprep.subr.mxu0 %v1971_v3 }
 0x8a6   :  { %3528 = vmatpush3.msra.mxu0 %v1971_v3  ;;  %v4510_v3 = vld [vmem:[%s4717_s11 + $0x58] sm:$0xff] }
 0x8a7   :  { %3529 = vmatprep.subr.mxu0 %v1970_v5 }
 0x8a8   :  { %3530 = vmatpush3.msra.mxu0 %v1970_v5  ;;  %v4517_v5 = vld [vmem:[%s4717_s11 + $0x50] sm:$0xff] }
 0x8a9   :  { %3575 = vmatprep.subr.mxu0 %v2176_v7 }
 0x945   :  { %v1786_v53 = vpop.f32.mrf.mxu0 }
 0x946   :  { %v1870_v54 = vrot.slane %v1786_v53, %v4279_v44  ;;  %v2161_v53 = vld [vmem:[#allocation6 + $0x100] sm:$0xff] }
 0x947   :  { %v3493_v55 = vpop.f32.mrf.mxu0 }
 0x948   :  { %v1871_v56 = vcombine.high %v1870_v54, %v1870_v54  ;;  %v1878_v10 = vrot.slane %v1870_v54, %v4279_v44  ;;  %v4545_v54 = vld [vmem:[%s4717_s11 + $0x30] sm:$0xff]  ;;  %v4552_v55 = vld [vmem:[%s4717_s11 + $0x28] sm:$0xff] }
 0x949   :  { %v1859_v11 = vpop.f32.mrf.mxu0 }
 0x94a   :  { %v1885_v12 = vrot.slane %v1871_v56, %v4279_v44  ;;  %v1907_v14 = vrot.slane %v1859_v11, %v4279_v44  ;;  %v1889_v15 = vrot.slane %v1878_v10, %v4149_v49  ;;  %v4559_v11 = vld [vmem:[%s4717_s11 + $0x20] sm:$0xff] }
 0x94b   :  { %v3498_v16 = vpop.f32.mrf.mxu0 }
 0x94c   :  { %v1893_v17 = vrot.slane %v1885_v12, %v4149_v49  ;;  %v1908_v18 = vcombine.high %v1907_v14, %v1907_v14  ;;  %v1915_v19 = vrot.slane %v1907_v14, %v4279_v44  ;;  %v1896_v21 = vmul.f32 %v1889_v15, %v4395_v22  ;;  %v2175_v22 = vld [vmem:[#allocation6 + $0x170] sm:$0xff]  ;;  %v4566_v12 = vld [vmem:[%s4717_s11 + $0x18] sm:$0xff]  ;;  %v4583_v16 = vld [vmem:[%s4718_s12] sm:$0xff] }
 0x94d   :  { %v1897_v23 = vmul.f32 %v1889_v15, %v4397_v33  ;;  %v2174_v33 = vld [vmem:[#allocation6 + $0x168] sm:$0xff]  ;;  %v4576_v15 = vld [vmem:[%s4717_s11 + $0x10] sm:$0xff] }
 0x94e   :  { %v1922_v20 = vrot.slane %v1908_v18, %v4279_v44  ;;  %v1926_v28 = vrot.slane %v1915_v19, %v4149_v49  ;;  %v1898_v34 = vmul.f32 %v1893_v17, %v4401_v31  ;;  %v1899_v29 = vmul.f32 %v1893_v17, %v4403_v32  ;;  %v2173_v31 = vld [vmem:[#allocation6 + $0x160] sm:$0xff]  ;;  %v2172_v32 = vld [vmem:[#allocation6 + $0x158] sm:$0xff]  ;;  %v4589_v17 = vld [vmem:[%s4717_s11 + $0x8] sm:$0xff] }
 0x94f   :  { %v4599_v18 = vld [vmem:[%s4717_s11] sm:$0xff] }
 0x950   :  { %v1930_v30 = vrot.slane %v1922_v20, %v4149_v49  ;;  %v1933_v35 = vadd.f32 %v1926_v28, %v1896_v21  ;;  %v1934_v37 = vadd.f32 %v1926_v28, %v1897_v23 }
 0x952   :  { %v1935_v39 = vadd.f32 %v1930_v30, %v1898_v34  ;;  %v1936_v36 = vadd.f32 %v1930_v30, %v1899_v29  ;;  %v1937_v38 = vmax.f32 %v1933_v35, 0.0  ;;  %v1938_v40 = vmax.f32 %v1934_v37, 0.0 }
 0x954   :  { %v1939_v41 = vmax.f32 %v1935_v39, 0.0  ;;  %v1940_v42 = vmax.f32 %v1936_v36, 0.0  ;;  %1941 = vst [vmem:[#allocation3 + $0x1] sm:$0xff] %v1937_v38  ;;  %1942 = vst [vmem:[#allocation3 + $0x9] sm:$0xff] %v1938_v40  ;;  %3531 = vmatprep.mubr.f32.mxu0 %v1937_v38 }
 0x955   :  { %3532 = vmatmul.mubr.f32.vlgmr.msra.gmra.mxu0 %v1938_v40 }
 0x956   :  { %1943 = vst [vmem:[#allocation3 + $0x19] sm:$0xff] %v1939_v41  ;;  %1944 = vst [vmem:[#allocation3 + $0x21] sm:$0xff] %v1940_v42  ;;  %3576 = vmatpush3.msra.mxu0 %v2176_v7  ;;  %3534 = vmatprep.mubr.f32.mxu0 %v1939_v41  ;;  %v4524_v7 = vld [vmem:[%s4717_s11 + $0x48] sm:$0xff] }
 0x957   :  { %3577 = vmatprep.subr.mxu0 %v2175_v22 }
 0x958   :  { %3578 = vmatpush3.msra.mxu0 %v2175_v22 }
 0x959   :  { %3579 = vmatprep.subr.mxu0 %v2174_v33  ;;  %3535 = vmatmul.mubr.f32.gmra.mxu0 %v1940_v42 }
 0x95a   :  { %3580 = vmatpush3.msra.mxu0 %v2174_v33 }
 0x95b   :  { %v1945_v43 = vld [vmem:[#allocation3] sm:$0xff]  ;;  %v1946_v46 = vld [vmem:[#allocation3 + $0x8] sm:$0xff]  ;;  %3581 = vmatprep.subr.mxu0 %v2173_v31 }
 0x95c   :  { %v2156_v47 = vld [vmem:[#allocation3 + $0x2] sm:$0xff]  ;;  %3569 = vmatprep.mubr.f32.mxu1 %v1945_v43  ;;  %3582 = vmatpush3.msra.mxu0 %v2173_v31  ;;  %v2157_v56 = vld [vmem:[#allocation3 + $0xa] sm:$0xff] }
 0x95d   :  { %v1947_v50 = vld [vmem:[#allocation3 + $0x18] sm:$0xff]  ;;  %3607 = vmatprep.mubr.f32.mxu0 %v2156_v47  ;;  %3570 = vmatmul.mubr.f32.vlgmr.msra.gmra.mxu1 %v1946_v46  ;;  %v1948_v58 = vld [vmem:[#allocation3 + $0x20] sm:$0xff] }
 0x95e   :  { %3572 = vmatprep.mubr.f32.mxu1 %v1947_v50  ;;  %3583 = vmatprep.subr.mxu0 %v2172_v32  ;;  %v2158_v10 = vld [vmem:[#allocation3 + $0x1a] sm:$0xff]  ;;  %v2159_v14 = vld [vmem:[#allocation3 + $0x22] sm:$0xff] }
 0x95f   :  { %3584 = vmatpush3.msra.mxu0 %v2172_v32  ;;  %3614 = vmatpush3.msra.mxu1 %v4482_v57 }
 0x960   :  { %3585 = vmatprep.subr.mxu0 %v2171_v51  ;;  %3615 = vmatprep.subr.mxu1 %v3783_v0 }
 0x961   :  { %3573 = vmatmul.mubr.f32.gmra.mxu1 %v1948_v58  ;;  %3586 = vmatpush3.msra.mxu0 %v2171_v51 }
 0x962   :  { %3587 = vmatprep.subr.mxu0 %v2170_v52  ;;  %3616 = vmatpush3.msra.mxu1 %v4489_v60 }
 0x963   :  { %3588 = vmatpush3.msra.mxu0 %v2170_v52  ;;  %3617 = vmatprep.subr.mxu1 %v3783_v0 }
 0x964   :  { %3589 = vmatprep.subr.mxu0 %v2169_v59  ;;  %3618 = vmatpush3.msra.mxu1 %v4496_v62 }
 0x965   :  { %3590 = vmatpush3.msra.mxu0 %v2169_v59  ;;  %3619 = vmatprep.subr.mxu1 %v3783_v0 }
 0x966   :  { %3591 = vmatprep.subr.mxu0 %v2168_v61  ;;  %3620 = vmatpush3.msra.mxu1 %v4503_v1 }
 0x967   :  { %3592 = vmatpush3.msra.mxu0 %v2168_v61  ;;  %3621 = vmatprep.subr.mxu1 %v3783_v0 }
 0x968   :  { %3593 = vmatprep.subr.mxu0 %v2167_v63  ;;  %3622 = vmatpush3.msra.mxu1 %v4510_v3 }
 0x969   :  { %3594 = vmatpush3.msra.mxu0 %v2167_v63  ;;  %3623 = vmatprep.subr.mxu1 %v3783_v0 }
 0x96a   :  { %3595 = vmatprep.subr.mxu0 %v2166_v2  ;;  %3624 = vmatpush3.msra.mxu1 %v4517_v5 }
 0x96b   :  { %3596 = vmatpush3.msra.mxu0 %v2166_v2  ;;  %3625 = vmatprep.subr.mxu1 %v3783_v0 }
 0x96c   :  { %3597 = vmatprep.subr.mxu0 %v2165_v4  ;;  %3626 = vmatpush3.msra.mxu1 %v4524_v7 }
 0x96d   :  { %3598 = vmatpush3.msra.mxu0 %v2165_v4  ;;  %3627 = vmatprep.subr.mxu1 %v3783_v0 }
 0x96e   :  { %3599 = vmatprep.subr.mxu0 %v2164_v6  ;;  %3628 = vmatpush3.msra.mxu1 %v4531_v9 }
 0x96f   :  { %3600 = vmatpush3.msra.mxu0 %v2164_v6  ;;  %3629 = vmatprep.subr.mxu1 %v3783_v0 }
 0x970   :  { %3601 = vmatprep.subr.mxu0 %v2163_v8  ;;  %3630 = vmatpush3.msra.mxu1 %v4538_v45 }
 0x971   :  { %3602 = vmatpush3.msra.mxu0 %v2163_v8  ;;  %3631 = vmatprep.subr.mxu1 %v3783_v0 }
 0x972   :  { %3603 = vmatprep.subr.mxu0 %v2162_v13  ;;  %3632 = vmatpush3.msra.mxu1 %v4545_v54 }
 0x973   :  { %3604 = vmatpush3.msra.mxu0 %v2162_v13  ;;  %3633 = vmatprep.subr.mxu1 %v3783_v0 }
 0x974   :  { %3605 = vmatprep.subr.mxu0 %v2161_v53  ;;  %3634 = vmatpush3.msra.mxu1 %v4552_v55 }
 0x975   :  { %3606 = vmatpush3.msra.mxu0 %v2161_v53  ;;  %3635 = vmatprep.subr.mxu1 %v3783_v0 }
 0x976   :  { %3608 = vmatmul.mubr.f32.vlgmr.msra.gmra.mxu0 %v2157_v56  ;;  %3636 = vmatpush3.msra.mxu1 %v4559_v11 }
 0x977   :  { %3610 = vmatprep.mubr.f32.mxu0 %v2158_v10  ;;  %3637 = vmatprep.subr.mxu1 %v3783_v0 }
 0x978   :  { %3638 = vmatpush3.msra.mxu1 %v4566_v12  ;;  %3645 = vmatprep.mubr.msk.f32.mxu1 %vm3784_vm0, %v3783_v0 }
 0x979   :  { %3639 = vmatprep.subr.mxu1 %v3783_v0  ;;  %3648 = vmatprep.subr.mxu0 %v3783_v0 }
 0x97a   :  { %3611 = vmatmul.mubr.f32.gmra.mxu0 %v2159_v14  ;;  %3640 = vmatpush3.msra.mxu1 %v4576_v15 }
 0x97b   :  { %3641 = vmatprep.subr.mxu1 %v3783_v0  ;;  %3649 = vmatpush3.msra.mxu0 %v4583_v16 }
 0x97c   :  { %3642 = vmatpush3.msra.mxu1 %v4589_v17  ;;  %3650 = vmatprep.mubr.msk.f32.mxu0 %vm3784_vm0, %v3783_v0 }
 0x97d   :  { %3643 = vmatprep.subr.mxu1 %v3783_v0  ;;  %3653 = vmatprep.subr.mxu0 %v3783_v0 }
 0x97e   :  { %3644 = vmatpush3.msra.mxu1 %v4599_v18 }
 0x97f   :  { %3688 = vmatprep.subr.mxu1 %v3783_v0 }
 0xa15   :  { %v3533_v19 = vpop.f32.mrf.mxu0 }
 0xa17   :  { %v2052_v21 = vpop.f32.mrf.mxu0 }
 0xa19   :  { %v3536_v28 = vpop.f32.mrf.mxu0 }
 0xa1b   :  { %v2062_v29 = vpop.f32.mrf.mxu0 }
 0xa1d   :  { %v3571_v20 = vpop.f32.mrf.mxu1 }
 0xa1e   :  { %v2143_v36 = vadd.f32 %v3571_v20, %v3533_v19  ;;  %v2515_v20 = vsub.s32 2, %v4146_v48 }
 0xa1f   :  { %v2137_v23 = vpop.f32.mrf.mxu1 }
 0xa20   :  { %v2138_v35 = vadd.f32 %v2137_v23, %v2052_v21  ;;  %v3733_v21 = vld [vmem:[%s4715_s9] sm:$0x7] }
 0xa21   :  { %v3574_v34 = vpop.f32.mrf.mxu1  ;;  %v2516_v23 = vrot.slane %v3733_v21, %v2515_v20 }
 0xa22   :  { %v2153_v33 = vadd.f32 %v3574_v34, %v3536_v28  ;;  %v2518_v28 = vpop.permute.xlu1 %2517 }
 0xa23   :  { %v2147_v37 = vpop.f32.mrf.mxu1 }
 0xa24   :  { %v2148_v41 = vadd.f32 %v2147_v37, %v2062_v29  ;;  %v2520_v29 = vadd.f32 %v2518_v28, %v2516_v23 }
 0xa36   :  { %v3609_v30 = vpop.f32.mrf.mxu0 }
 0xa37   :  { %v4605_v42 = vadd.f32 %v3609_v30, %v2143_v36  ;;  %v3734_v30 = vld [vmem:[%s4716_s10] sm:$0x7] }
 0xa38   :  { %v2243_v39 = vpop.f32.mrf.mxu0 }
 0xa39   :  { %v4603_v38 = vadd.f32 %v2243_v39, %v2138_v35  ;;  %v2524_v35 = vrot.slane %v3734_v30, %v2515_v20  ;;  %v2526_v39 = vpop.permute.xlu0 %2525 }
 0xa3a   :  { %v3612_v40 = vpop.f32.mrf.mxu0 }
 0xa3b   :  { %v2266_v31 = vadd.f32 %v4605_v42, %v4603_v38  ;;  %v4611_v43 = vadd.f32 %v3612_v40, %v2153_v33  ;;  %v2528_v40 = vadd.f32 %v2526_v39, %v2524_v35 }
 0xa3c   :  { %v2253_v22 = vpop.f32.mrf.mxu0 }
 0xa3d   :  { %v4609_v32 = vadd.f32 %v2253_v22, %v2148_v41 }
 0xa3f   :  { %v2267_v46 = vadd.f32 %v2266_v31, %v4609_v32 }
 0xa41   :  { %v2268_v47 = vadd.f32 %v2267_v46, %v4611_v43 }
 0xa43   :  { %v2269_v50 = vrot.slane %v2268_v47, 4 }
 0xa45   :  { %v2270_v51 = vadd.f32 %v2269_v50, %v2268_v47 }
 0xa47   :  { %v2271_v52 = vrot.slane %v2270_v51, 2 }
 0xa49   :  { %v2272_v58 = vadd.f32 %v2271_v52, %v2270_v51 }
 0xa4b   :  { %v2273_v59 = vrot.slane %v2272_v58, 1 }
 0xa4d   :  { %v2274_v61 = vadd.f32 %v2273_v59, %v2272_v58 }
 0xa4f   :  { %3646 = vmatmul.mubr.f32.vlgmr.msra.gmra.mxu1 %v2274_v61 }
 0xa50   :  { %3689 = vmatpush3.msra.mxu1 %v4583_v16  ;;  %3690 = vmatprep.mubr.msk.f32.mxu1 %vm3784_vm0, %v3783_v0 }
 0xa51   :  { %3693 = vmatprep.subr.mxu1 %v3783_v0 }
 0xb0f   :  { %v2341_v63 = vpop.f32.mrf.mxu1 }
 0xb10   :  { %v4619_v2 = vmul.f32 0.001953125, %v2341_v63 }
 0xb11   :  { %v3647_v4 = vpop.f32.mrf.mxu1 }
 0xb12   :  { %3651 = vmatmul.mubr.msk.f32.vlgmr.msra.gmra.mxu0 %vm701_vm5, %v4619_v2  ;;  %v2537_v36 = vrot.slane %v4619_v2, %v4149_v49 }
 0xb13   :  { %3654 = vmatpush3.msra.mxu0 %v4482_v57  ;;  %3685 = vmatprep.mubr.msk.f32.mxu0 %vm3784_vm0, %v3783_v0 }
 0xb14   :  { %3655 = vmatprep.subr.mxu0 %v3783_v0 }
 0xb15   :  { %3656 = vmatpush3.msra.mxu0 %v4489_v60 }
 0xb16   :  { %3657 = vmatprep.subr.mxu0 %v3783_v0 }
 0xb17   :  { %3658 = vmatpush3.msra.mxu0 %v4496_v62 }
 0xb18   :  { %3659 = vmatprep.subr.mxu0 %v3783_v0 }
 0xb19   :  { %3660 = vmatpush3.msra.mxu0 %v4503_v1 }
 0xb1a   :  { %3661 = vmatprep.subr.mxu0 %v3783_v0 }
 0xb1b   :  { %3662 = vmatpush3.msra.mxu0 %v4510_v3 }
 0xb1c   :  { %3663 = vmatprep.subr.mxu0 %v3783_v0 }
 0xb1d   :  { %3664 = vmatpush3.msra.mxu0 %v4517_v5 }
 0xb1e   :  { %3665 = vmatprep.subr.mxu0 %v3783_v0 }
 0xb1f   :  { %3666 = vmatpush3.msra.mxu0 %v4524_v7 }
 0xb20   :  { %3667 = vmatprep.subr.mxu0 %v3783_v0 }
 0xb21   :  { %3668 = vmatpush3.msra.mxu0 %v4531_v9 }
 0xb22   :  { %3669 = vmatprep.subr.mxu0 %v3783_v0 }
 0xb23   :  { %3670 = vmatpush3.msra.mxu0 %v4538_v45 }
 0xb24   :  { %3671 = vmatprep.subr.mxu0 %v3783_v0 }
 0xb25   :  { %3672 = vmatpush3.msra.mxu0 %v4545_v54 }
 0xb26   :  { %3673 = vmatprep.subr.mxu0 %v3783_v0 }
 0xb27   :  { %3674 = vmatpush3.msra.mxu0 %v4552_v55 }
 0xb28   :  { %3675 = vmatprep.subr.mxu0 %v3783_v0 }
 0xb29   :  { %3676 = vmatpush3.msra.mxu0 %v4559_v11 }
 0xb2a   :  { %3677 = vmatprep.subr.mxu0 %v3783_v0 }
 0xb2b   :  { %3678 = vmatpush3.msra.mxu0 %v4566_v12 }
 0xb2c   :  { %3679 = vmatprep.subr.mxu0 %v3783_v0 }
 0xb2d   :  { %3680 = vmatpush3.msra.mxu0 %v4576_v15 }
 0xb2e   :  { %3681 = vmatprep.subr.mxu0 %v3783_v0 }
 0xb2f   :  { %3682 = vmatpush3.msra.mxu0 %v4589_v17 }
 0xb30   :  { %3683 = vmatprep.subr.mxu0 %v3783_v0 }
 0xb31   :  { %3684 = vmatpush3.msra.mxu0 %v4599_v18 }
 0xbd2   :  { %v2415_v57 = vpop.f32.mrf.mxu0 }
 0xbd3   :  { %v2422_v60 = vrot.slane %v2415_v57, %v4149_v49 }
 0xbd4   :  { %v3652_v62 = vpop.f32.mrf.mxu0 }
 0xbd5   :  { %v2423_v1 = vsub.f32 %v4603_v38, %v2422_v60  ;;  %v2424_v3 = vsub.f32 %v4605_v42, %v2422_v60  ;;  %v2425_v5 = vsub.f32 %v4609_v32, %v2422_v60  ;;  %v2426_v6 = vsub.f32 %v4611_v43, %v2422_v60 }
 0xbd7   :  { %v2427_v7 = vmul.f32 %v2423_v1, %v2423_v1  ;;  %v2428_v8 = vmul.f32 %v2424_v3, %v2424_v3  ;;  %v2429_v9 = vmul.f32 %v2425_v5, %v2425_v5  ;;  %v2430_v45 = vmul.f32 %v2426_v6, %v2426_v6 }
 0xbd9   :  { %v2431_v13 = vadd.f32 %v2428_v8, %v2427_v7 }
 0xbdb   :  { %v2432_v53 = vadd.f32 %v2431_v13, %v2429_v9 }
 0xbdd   :  { %v2433_v54 = vadd.f32 %v2432_v53, %v2430_v45 }
 0xbdf   :  { %v2434_v55 = vrot.slane %v2433_v54, 4 }
 0xbe1   :  { %v2435_v56 = vadd.f32 %v2434_v55, %v2433_v54 }
 0xbe3   :  { %v2436_v10 = vrot.slane %v2435_v56, 2 }
 0xbe5   :  { %v2437_v11 = vadd.f32 %v2436_v10, %v2435_v56 }
 0xbe7   :  { %v2438_v12 = vrot.slane %v2437_v11, 1 }
 0xbe9   :  { %v2439_v14 = vadd.f32 %v2438_v12, %v2437_v11 }
 0xbeb   :  { %3686 = vmatmul.mubr.f32.vlgmr.msra.gmra.mxu0 %v2439_v14 }
 0xcab   :  { %v2506_v15 = vpop.f32.mrf.mxu0 }
 0xcac   :  { %v2510_v17 = vmul.f32 0.001953125, %v2506_v15 }
 0xcad   :  { %v3687_v18 = vpop.f32.mrf.mxu0 }
 0xcae   :  { %v2511_v19 = vadd.f32 1e-05, %v2510_v17 }
 0xcb0   :  { %3714 = vrsqrt.f32 %v2511_v19 }
 0xcbd   :  { %v3715_v34 = vpop.eup %3714 }
 0xcbe   :  { %v2532_v37 = vrot.slane %v3715_v34, %v4149_v49 }
 0xcc0   :  { %v2533_v48 = vmul.f32 %v2532_v37, %v2520_v29 }
 0xcc2   :  { %3691 = vmatmul.mubr.msk.f32.vlgmr.msra.gmra.mxu1 %vm701_vm5, %v2533_v48  ;;  %v2538_v41 = vmul.f32 %v2537_v36, %v2533_v48 }
 0xcc3   :  { %3694 = vmatpush3.msra.mxu1 %v4583_v16  ;;  %3695 = vmatprep.mubr.msk.f32.mxu1 %vm3784_vm0, %v3783_v0 }
 0xcc4   :  { %v2539_v22 = vsub.f32 %v2528_v40, %v2538_v41 }
 0xcc6   :  { %3696 = vmatmul.mubr.msk.f32.vlgmr.msra.gmra.mxu1 %vm701_vm5, %v2539_v22 }
 0xd82   :  { %v2609_v33 = vpop.f32.mrf.mxu1 }
 0xd83   :  { %v2693_v31 = vrot.slane %v2609_v33, %v4279_v44 }
 0xd84   :  { %v3692_v46 = vpop.f32.mrf.mxu1 }
 0xd85   :  { %v2694_v47 = vcombine.high %v2693_v31, %v2693_v31  ;;  %v2701_v50 = vrot.slane %v2693_v31, %v4279_v44 }
 0xd86   :  { %v2682_v51 = vpop.f32.mrf.mxu1 }
 0xd87   :  { %v2708_v52 = vrot.slane %v2694_v47, %v4279_v44  ;;  %v2730_v58 = vrot.slane %v2682_v51, %v4279_v44  ;;  %v2712_v16 = vrot.slane %v2701_v50, %v4149_v49 }
 0xd88   :  { %v3697_v59 = vpop.f32.mrf.mxu1 }
 0xd89   :  { %v2716_v0 = vrot.slane %v2708_v52, %v4149_v49  ;;  %v2731_v61 = vcombine.high %v2730_v58, %v2730_v58  ;;  %v2738_v63 = vrot.slane %v2730_v58, %v4279_v44  ;;  %v2719_v4 = vmul.f32 %v2712_v16, %v4603_v38 }
 0xd8a   :  { %v2720_v57 = vmul.f32 %v2712_v16, %v4605_v42 }
 0xd8b   :  { %v2745_v2 = vrot.slane %v2731_v61, %v4279_v44  ;;  %v2749_v60 = vrot.slane %v2738_v63, %v4149_v49  ;;  %v2721_v62 = vmul.f32 %v2716_v0, %v4609_v32  ;;  %v2722_v1 = vmul.f32 %v2716_v0, %v4611_v43 }
 0xd8d   :  { %v2753_v3 = vrot.slane %v2745_v2, %v4149_v49  ;;  %v2756_v5 = vadd.f32 %v2749_v60, %v2719_v4  ;;  %v2757_v6 = vadd.f32 %v2749_v60, %v2720_v57 }
 0xd8f   :  { %v2758_v7 = vadd.f32 %v2753_v3, %v2721_v62  ;;  %v2759_v8 = vadd.f32 %v2753_v3, %v2722_v1  ;;  %v2760_v9 = vadd.f32 %v2756_v5, %v4295_v24  ;;  %v2761_v44 = vadd.f32 %v2757_v6, %v4297_v25 }
 0xd91   :  { %v2762_v38 = vadd.f32 %v2758_v7, %v4299_v27  ;;  %v2763_v42 = vadd.f32 %v2759_v8, %v4301_v26  ;;  %v2764_v13 = vmax.f32 %v2760_v9, 0.0  ;;  %v2765_v45 = vmax.f32 %v2761_v44, 0.0 }
 0xd93   :  { %v2766_v53 = vmax.f32 %v2762_v38, 0.0  ;;  %v2767_v32 = vmax.f32 %v2763_v42, 0.0  ;;  %2768 = vst [vmem:[%s4719_s13] sm:$0xff] %v2764_v13  ;;  %2769 = vst [vmem:[%s4719_s13 + $0x8] sm:$0xff] %v2765_v45 }
 0xd95   :  { %2770 = vst [vmem:[%s4719_s13 + $0x10] sm:$0xff] %v2766_v53  ;;  %2771 = vst [vmem:[%s4719_s13 + $0x18] sm:$0xff] %v2767_v32 }
 0xd96   :  { %2776 = vsyncpa [#allocation5], 1 }
 0xd97   :  { %2777 = vsyncpa [#allocation7], 1 }

</bundles_post_ra>
